<compile_context>
chip_gen: v7x
topology: tpu7x:2x2x1
jax: 0.10.0
libtpu: 0.0.40
codegen_flags: <defaults>
</compile_context>

<pallas_src>
import jax
import jax.numpy as jnp
import numpy as np
from jax.experimental import pallas as pl
from jax.experimental.pallas import tpu as pltpu


def _decoder_kernel(emb_ref, hs_ref, h0_ref,
                    wih_ref, whh_ref, bih_ref, bhh_ref,
                    wlin_top_ref, wlin_bot_ref, blin_ref,
                    logits_ref, state_ref, attn_ref,
                    out_tbh_ref):
    T, Bb, E = emb_ref.shape
    H = h0_ref.shape[1]

    # ---- GRU input-side gate projections, all timesteps at once (M = T*Bb) ----
    # r/z recurrent biases folded in here (hoisted out of the serial loop); the n
    # gate's recurrent bias must stay inside (it is scaled by r).
    emb2d = emb_ref[...].reshape(T * Bb, E)             # t-major rows: t*Bb + b
    xg_r = (jnp.dot(emb2d, wih_ref[0], preferred_element_type=jnp.float32)
            + bih_ref[0] + bhh_ref[0])
    xg_z = (jnp.dot(emb2d, wih_ref[1], preferred_element_type=jnp.float32)
            + bih_ref[1] + bhh_ref[1])
    xg_n = jnp.dot(emb2d, wih_ref[2], preferred_element_type=jnp.float32) + bih_ref[2]

    # ---- sequential GRU recurrence (PyTorch gate order r, z, n) ----------------
    # T is small here so the loop is fully unrolled (LLO scheduler visibility); for
    # long sequences convert to lax.fori_loop with `h` as carry (out_tbh_ref[t]
    # also accepts a traced t).
    h = h0_ref[...]                                     # (Bb, H)
    for t in range(T):
        lo = t * Bb                                     # static, Bb-aligned slice
        hg_r = jnp.dot(h, whh_ref[0], preferred_element_type=jnp.float32)
        hg_z = jnp.dot(h, whh_ref[1], preferred_element_type=jnp.float32)
        hg_n = jnp.dot(h, whh_ref[2], preferred_element_type=jnp.float32) + bhh_ref[2]
        r = jax.nn.sigmoid(xg_r[lo:lo + Bb, :] + hg_r)
        z = jax.nn.sigmoid(xg_z[lo:lo + Bb, :] + hg_z)
        n = jnp.tanh(xg_n[lo:lo + Bb, :] + r * hg_n)
        h = (1.0 - z) * n + z * h
        out_tbh_ref[t] = h                              # full-tile scratch store

    state_ref[...] = h                                  # final hidden (Bb, H)

    # ---- attention: scores over S, softmax along the lane axis ------------------
    hs3 = hs_ref[...]                                   # (Bb, S, H)
    out_bth = jnp.swapaxes(out_tbh_ref[...], 0, 1)      # (Bb, T, H) — single relayout
    s = jnp.einsum("bth,bsh->bts", out_bth, hs3,
                   preferred_element_type=jnp.float32)  # (Bb, T, S)
    s_max = jnp.max(s, axis=-1, keepdims=True)
    p = jnp.exp(s - s_max)
    denom = jnp.sum(p, axis=-1, keepdims=True)
    aw = p * pl.reciprocal(denom, approx=False)         # exact: keeps 1e-4 match
    attn_ref[...] = aw                                  # lane-dense (S on lanes)

    c = jnp.einsum("bts,bsh->bth", aw, hs3,
                   preferred_element_type=jnp.float32)  # (Bb, T, H)

    # ---- concat-free final linear: out @ W_top + c @ W_bot + b ------------------
    out2d = out_bth.reshape(Bb * T, H)
    c2d = c.reshape(Bb * T, H)
    logits2d = (jnp.dot(out2d, wlin_top_ref[...], preferred_element_type=jnp.float32)
                + jnp.dot(c2d, wlin_bot_ref[...], preferred_element_type=jnp.float32)
                + blin_ref[...])                        # (Bb*T, Vp)
    logits_ref[...] = logits2d.reshape(Bb, T, logits_ref.shape[2])


def attention_decoder_forward(sequence, hs, h, params, *, block_b=8):
    """Pallas implementation of AttentionDecoder.forward."""
    B, T = sequence.shape
    _, S, H = hs.shape
    V, E = params["emb_table"].shape

    Bb = block_b
    B_pad = ((B + Bb - 1) // Bb) * Bb
    nb = B_pad // Bb
    Vp = ((V + 127) // 128) * 128                       # lane-dense logits store

    # --- glue (plain JAX): pad batch, embedding gather, parameter layout ---------
    # TODO(synk): the nn.Embedding gather stays in plain JAX; an in-kernel version
    # would need a manual make_async_copy gather per token.
    seq_p = jnp.zeros((B_pad, T), jnp.int32).at[:B].set(sequence)
    hs_p = jnp.zeros((B_pad, S, H), jnp.float32).at[:B].set(hs)
    h0_p = jnp.zeros((B_pad, H), jnp.float32).at[:B].set(h[0])

    emb = jnp.take(params["emb_table"], seq_p, axis=0)  # (B_pad, T, E)
    emb_tbe = jnp.transpose(emb, (1, 0, 2))             # (T, B_pad, E), t-major

    # Gate-major GRU weights: gate index on the leading (major) axis.
    wih3 = params["w_ih"].reshape(3, H, E).transpose(0, 2, 1)   # (3, E, H)
    whh3 = params["w_hh"].reshape(3, H, H).transpose(0, 2, 1)   # (3, H, H)
    bih3 = params["b_ih"].reshape(3, 1, H)
    bhh3 = params["b_hh"].reshape(3, 1, H)

    # Split + lane-pad the output projection (removes the concat in the kernel).
    wlin = params["w_lin"]                              # (V, 2H)
    wlin_top = jnp.zeros((H, Vp), jnp.float32).at[:, :V].set(wlin[:, :H].T)
    wlin_bot = jnp.zeros((H, Vp), jnp.float32).at[:, :V].set(wlin[:, H:].T)
    blin = jnp.zeros((1, Vp), jnp.float32).at[0, :V].set(params["b_lin"])

    full = lambda shape: pl.BlockSpec(shape, lambda b: (0,) * len(shape))

    grid_spec = pltpu.PrefetchScalarGridSpec(
        num_scalar_prefetch=0,
        grid=(nb,),
        in_specs=[
            pl.BlockSpec((T, Bb, E), lambda b: (0, b, 0)),   # embeddings (t-major)
            pl.BlockSpec((Bb, S, H), lambda b: (b, 0, 0)),   # encoder states
            pl.BlockSpec((Bb, H), lambda b: (b, 0)),         # initial hidden
            full((3, E, H)),                                 # W_ih per gate
            full((3, H, H)),                                 # W_hh per gate
            full((3, 1, H)),                                 # b_ih per gate
            full((3, 1, H)),                                 # b_hh per gate
            full((H, Vp)),                                   # W_lin (out half)
            full((H, Vp)),                                   # W_lin (ctx half)
            full((1, Vp)),                                   # b_lin
        ],
        out_specs=[
            pl.BlockSpec((Bb, T, Vp), lambda b: (b, 0, 0)),  # logits (lane-dense)
            pl.BlockSpec((Bb, H), lambda b: (b, 0)),         # final hidden
            pl.BlockSpec((Bb, T, S), lambda b: (b, 0, 0)),   # attention (S on lanes)
        ],
        scratch_shapes=[pltpu.VMEM((T, Bb, H), jnp.float32)],
    )

    logits_p, state_p, attn_p = pl.pallas_call(
        _decoder_kernel,
        out_shape=(
            jax.ShapeDtypeStruct((B_pad, T, Vp), jnp.float32),
            jax.ShapeDtypeStruct((B_pad, H), jnp.float32),
            jax.ShapeDtypeStruct((B_pad, T, S), jnp.float32),
        ),
        grid_spec=grid_spec,
        compiler_params=pltpu.CompilerParams(
            dimension_semantics=("parallel",)),
    )(emb_tbe, hs_p, h0_p, wih3, whh3, bih3, bhh3, wlin_top, wlin_bot, blin)

    logits = logits_p[:B, :, :V]                        # (B, T, V)
    state = state_p[:B][None, :, :]                     # (1, B, H), torch GRU layout
    attn = jnp.transpose(attn_p[:B], (0, 2, 1))         # (B, S, T), torch layout
    return logits, state, attn


def reference_forward(sequence, hs, h, params):
    """Pure-JAX reference matching the PyTorch module semantics."""
    emb = jnp.take(params["emb_table"], sequence, axis=0)    # (B, T, E)
    B, T, _ = emb.shape
    H = hs.shape[2]
    w_ih, w_hh = params["w_ih"], params["w_hh"]
    b_ih, b_hh = params["b_ih"], params["b_hh"]
    hprev = h[0]                                             # (B, H)
    outs = []
    for t in range(T):
        x = emb[:, t, :]
        xg = x @ w_ih.T + b_ih
        hg = hprev @ w_hh.T + b_hh
        r = jax.nn.sigmoid(xg[:, :H] + hg[:, :H])
        z = jax.nn.sigmoid(xg[:, H:2 * H] + hg[:, H:2 * H])
        n = jnp.tanh(xg[:, 2 * H:] + r * hg[:, 2 * H:])
        hprev = (1.0 - z) * n + z * hprev
        outs.append(hprev)
    out = jnp.stack(outs, axis=1)                            # (B, T, H)
    s = jnp.einsum("bsh,bth->bst", hs, out)                  # (B, S, T)
    aw = jax.nn.softmax(s, axis=1)
    c = jnp.einsum("bst,bsh->bth", aw, hs)                   # (B, T, H)
    cat = jnp.concatenate([out, c], axis=2)                  # (B, T, 2H)
    logits = cat @ params["w_lin"].T + params["b_lin"]       # (B, T, V)
    return logits, hprev[None], aw


def init_params(key, vocab_size, embedding_dim, hidden_dim):
    ks = jax.random.split(key, 7)
    u = lambda k, shape: jax.random.uniform(k, shape, jnp.float32, -0.1, 0.1)
    emb_table = u(ks[0], (vocab_size, embedding_dim))
    emb_table = emb_table.at[0].set(0.0)                     # padding_idx=0
    return {
        "emb_table": emb_table,
        "w_ih": u(ks[1], (3 * hidden_dim, embedding_dim)),
        "w_hh": u(ks[2], (3 * hidden_dim, hidden_dim)),
        "b_ih": u(ks[3], (3 * hidden_dim,)),
        "b_hh": u(ks[4], (3 * hidden_dim,)),
        "w_lin": u(ks[5], (vocab_size, 2 * hidden_dim)),
        "b_lin": u(ks[6], (vocab_size,)),
    }


if __name__ == "__main__":
    B, T, S = 2, 8, 10
    E, H, V = 16, 32, 20

    key = jax.random.PRNGKey(0)
    kp, kseq, khs, kh = jax.random.split(key, 4)

    params = init_params(kp, V, E, H)
    sequence = jax.random.randint(kseq, (B, T), 0, V, dtype=jnp.int32)
    hs = jax.random.normal(khs, (B, S, H), jnp.float32)
    h = jax.random.normal(kh, (1, B, H), jnp.float32)

    logits, state, attn = attention_decoder_forward(sequence, hs, h, params)
    jax.block_until_ready((logits, state, attn))

    ref_logits, ref_state, ref_attn = reference_forward(sequence, hs, h, params)
    assert np.allclose(np.asarray(logits), np.asarray(ref_logits), rtol=1e-4, atol=1e-4)
    assert np.allclose(np.asarray(state), np.asarray(ref_state), rtol=1e-4, atol=1e-4)
    assert np.allclose(np.asarray(attn), np.asarray(ref_attn), rtol=1e-4, atol=1e-4)

    print("KERNEL_OK")
</pallas_src>

<mosaic_0001>
module attributes {stable_mosaic.version = 11 : i64} {
  func.func @_decoder_kernel(%arg0: i32, %arg1: memref<8x8x16xf32, #tpu.memory_space<vmem>>, %arg2: memref<8x10x32xf32, #tpu.memory_space<vmem>>, %arg3: memref<8x32xf32, #tpu.memory_space<vmem>>, %arg4: memref<3x16x32xf32, #tpu.memory_space<vmem>>, %arg5: memref<3x32x32xf32, #tpu.memory_space<vmem>>, %arg6: memref<3x1x32xf32, #tpu.memory_space<vmem>>, %arg7: memref<3x1x32xf32, #tpu.memory_space<vmem>>, %arg8: memref<32x128xf32, #tpu.memory_space<vmem>>, %arg9: memref<32x128xf32, #tpu.memory_space<vmem>>, %arg10: memref<1x128xf32, #tpu.memory_space<vmem>>, %arg11: memref<8x8x128xf32, #tpu.memory_space<vmem>>, %arg12: memref<8x32xf32, #tpu.memory_space<vmem>>, %arg13: memref<8x8x10xf32, #tpu.memory_space<vmem>>, %arg14: memref<8x8x32xf32, #tpu.memory_space<vmem>>) attributes {dimension_semantics = [#tpu.dimension_semantics<parallel>], iteration_bounds = array<i64: 1>, scalar_prefetch = 0 : i64, scratch_operands = 1 : i64, tpu.core_type = #tpu.core_type<tc>, window_params = [{transform_indices = @transform_0, window_bounds = array<i64: 8, 8, 16>}, {transform_indices = @transform_1, window_bounds = array<i64: 8, 10, 32>}, {transform_indices = @transform_2, window_bounds = array<i64: 8, 32>}, {pipeline_mode = #tpu.pipeline_mode<synchronous>, transform_indices = @transform_3, window_bounds = array<i64: 3, 16, 32>}, {pipeline_mode = #tpu.pipeline_mode<synchronous>, transform_indices = @transform_4, window_bounds = array<i64: 3, 32, 32>}, {pipeline_mode = #tpu.pipeline_mode<synchronous>, transform_indices = @transform_5, window_bounds = array<i64: 3, 1, 32>}, {pipeline_mode = #tpu.pipeline_mode<synchronous>, transform_indices = @transform_6, window_bounds = array<i64: 3, 1, 32>}, {pipeline_mode = #tpu.pipeline_mode<synchronous>, transform_indices = @transform_7, window_bounds = array<i64: 32, 128>}, {pipeline_mode = #tpu.pipeline_mode<synchronous>, transform_indices = @transform_8, window_bounds = array<i64: 32, 128>}, {pipeline_mode = #tpu.pipeline_mode<synchronous>, transform_indices = @transform_9, window_bounds = array<i64: 1, 128>}, {transform_indices = @transform_10, window_bounds = array<i64: 8, 8, 128>}, {transform_indices = @transform_11, window_bounds = array<i64: 8, 32>}, {transform_indices = @transform_12, window_bounds = array<i64: 8, 8, 10>}]} {
    %c0 = arith.constant 0 : index
    %c0_0 = arith.constant 0 : index
    %c0_1 = arith.constant 0 : index
    %0 = vector.load %arg1[%c0, %c0_0, %c0_1] : memref<8x8x16xf32, #tpu.memory_space<vmem>>, vector<8x8x16xf32>
    %1 = vector.shape_cast %0 : vector<8x8x16xf32> to vector<64x16xf32>
    %c0_2 = arith.constant 0 : index
    %c0_3 = arith.constant 0 : index
    %c0_4 = arith.constant 0 : index
    %2 = vector.load %arg4[%c0_2, %c0_3, %c0_4] : memref<3x16x32xf32, #tpu.memory_space<vmem>>, vector<1x16x32xf32>
    %3 = vector.shape_cast %2 : vector<1x16x32xf32> to vector<16x32xf32>
    %cst = arith.constant dense<0.000000e+00> : vector<64x32xf32>
    %4 = tpu.matmul %1, %3, %cst {dimension_numbers = #tpu.dot_dimension_numbers<[1], [0], [0], [1], [0, 0, 1, 1], [], []>} : vector<64x16xf32>, vector<16x32xf32>, vector<64x32xf32> -> vector<64x32xf32>
    %c0_5 = arith.constant 0 : index
    %c0_6 = arith.constant 0 : index
    %c0_7 = arith.constant 0 : index
    %5 = vector.load %arg6[%c0_5, %c0_6, %c0_7] : memref<3x1x32xf32, #tpu.memory_space<vmem>>, vector<1x1x32xf32>
    %6 = vector.shape_cast %5 : vector<1x1x32xf32> to vector<1x32xf32>
    %7 = vector.broadcast %6 : vector<1x32xf32> to vector<64x32xf32>
    %8 = arith.addf %4, %7 : vector<64x32xf32>
    %c0_8 = arith.constant 0 : index
    %c0_9 = arith.constant 0 : index
    %c0_10 = arith.constant 0 : index
    %9 = vector.load %arg7[%c0_8, %c0_9, %c0_10] : memref<3x1x32xf32, #tpu.memory_space<vmem>>, vector<1x1x32xf32>
    %10 = vector.shape_cast %9 : vector<1x1x32xf32> to vector<1x32xf32>
    %11 = vector.broadcast %10 : vector<1x32xf32> to vector<64x32xf32>
    %12 = arith.addf %8, %11 : vector<64x32xf32>
    %c1 = arith.constant 1 : index
    %c0_11 = arith.constant 0 : index
    %c0_12 = arith.constant 0 : index
    %13 = vector.load %arg4[%c1, %c0_11, %c0_12] : memref<3x16x32xf32, #tpu.memory_space<vmem>>, vector<1x16x32xf32>
    %14 = vector.shape_cast %13 : vector<1x16x32xf32> to vector<16x32xf32>
    %cst_13 = arith.constant dense<0.000000e+00> : vector<64x32xf32>
    %15 = tpu.matmul %1, %14, %cst_13 {dimension_numbers = #tpu.dot_dimension_numbers<[1], [0], [0], [1], [0, 0, 1, 1], [], []>} : vector<64x16xf32>, vector<16x32xf32>, vector<64x32xf32> -> vector<64x32xf32>
    %c1_14 = arith.constant 1 : index
    %c0_15 = arith.constant 0 : index
    %c0_16 = arith.constant 0 : index
    %16 = vector.load %arg6[%c1_14, %c0_15, %c0_16] : memref<3x1x32xf32, #tpu.memory_space<vmem>>, vector<1x1x32xf32>
    %17 = vector.shape_cast %16 : vector<1x1x32xf32> to vector<1x32xf32>
    %18 = vector.broadcast %17 : vector<1x32xf32> to vector<64x32xf32>
    %19 = arith.addf %15, %18 : vector<64x32xf32>
    %c1_17 = arith.constant 1 : index
    %c0_18 = arith.constant 0 : index
    %c0_19 = arith.constant 0 : index
    %20 = vector.load %arg7[%c1_17, %c0_18, %c0_19] : memref<3x1x32xf32, #tpu.memory_space<vmem>>, vector<1x1x32xf32>
    %21 = vector.shape_cast %20 : vector<1x1x32xf32> to vector<1x32xf32>
    %22 = vector.broadcast %21 : vector<1x32xf32> to vector<64x32xf32>
    %23 = arith.addf %19, %22 : vector<64x32xf32>
    %c2 = arith.constant 2 : index
    %c0_20 = arith.constant 0 : index
    %c0_21 = arith.constant 0 : index
    %24 = vector.load %arg4[%c2, %c0_20, %c0_21] : memref<3x16x32xf32, #tpu.memory_space<vmem>>, vector<1x16x32xf32>
    %25 = vector.shape_cast %24 : vector<1x16x32xf32> to vector<16x32xf32>
    %cst_22 = arith.constant dense<0.000000e+00> : vector<64x32xf32>
    %26 = tpu.matmul %1, %25, %cst_22 {dimension_numbers = #tpu.dot_dimension_numbers<[1], [0], [0], [1], [0, 0, 1, 1], [], []>} : vector<64x16xf32>, vector<16x32xf32>, vector<64x32xf32> -> vector<64x32xf32>
    %c2_23 = arith.constant 2 : index
    %c0_24 = arith.constant 0 : index
    %c0_25 = arith.constant 0 : index
    %27 = vector.load %arg6[%c2_23, %c0_24, %c0_25] : memref<3x1x32xf32, #tpu.memory_space<vmem>>, vector<1x1x32xf32>
    %28 = vector.shape_cast %27 : vector<1x1x32xf32> to vector<1x32xf32>
    %29 = vector.broadcast %28 : vector<1x32xf32> to vector<64x32xf32>
    %30 = arith.addf %26, %29 : vector<64x32xf32>
    %c0_26 = arith.constant 0 : index
    %c0_27 = arith.constant 0 : index
    %31 = vector.load %arg3[%c0_26, %c0_27] : memref<8x32xf32, #tpu.memory_space<vmem>>, vector<8x32xf32>
    %c0_28 = arith.constant 0 : index
    %c0_29 = arith.constant 0 : index
    %c0_30 = arith.constant 0 : index
    %32 = vector.load %arg5[%c0_28, %c0_29, %c0_30] : memref<3x32x32xf32, #tpu.memory_space<vmem>>, vector<1x32x32xf32>
    %33 = vector.shape_cast %32 : vector<1x32x32xf32> to vector<32x32xf32>
    %cst_31 = arith.constant dense<0.000000e+00> : vector<8x32xf32>
    %34 = tpu.matmul %31, %33, %cst_31 {dimension_numbers = #tpu.dot_dimension_numbers<[1], [0], [0], [1], [0, 0, 1, 1], [], []>} : vector<8x32xf32>, vector<32x32xf32>, vector<8x32xf32> -> vector<8x32xf32>
    %c1_32 = arith.constant 1 : index
    %c0_33 = arith.constant 0 : index
    %c0_34 = arith.constant 0 : index
    %35 = vector.load %arg5[%c1_32, %c0_33, %c0_34] : memref<3x32x32xf32, #tpu.memory_space<vmem>>, vector<1x32x32xf32>
    %36 = vector.shape_cast %35 : vector<1x32x32xf32> to vector<32x32xf32>
    %cst_35 = arith.constant dense<0.000000e+00> : vector<8x32xf32>
    %37 = tpu.matmul %31, %36, %cst_35 {dimension_numbers = #tpu.dot_dimension_numbers<[1], [0], [0], [1], [0, 0, 1, 1], [], []>} : vector<8x32xf32>, vector<32x32xf32>, vector<8x32xf32> -> vector<8x32xf32>
    %c2_36 = arith.constant 2 : index
    %c0_37 = arith.constant 0 : index
    %c0_38 = arith.constant 0 : index
    %38 = vector.load %arg5[%c2_36, %c0_37, %c0_38] : memref<3x32x32xf32, #tpu.memory_space<vmem>>, vector<1x32x32xf32>
    %39 = vector.shape_cast %38 : vector<1x32x32xf32> to vector<32x32xf32>
    %cst_39 = arith.constant dense<0.000000e+00> : vector<8x32xf32>
    %40 = tpu.matmul %31, %39, %cst_39 {dimension_numbers = #tpu.dot_dimension_numbers<[1], [0], [0], [1], [0, 0, 1, 1], [], []>} : vector<8x32xf32>, vector<32x32xf32>, vector<8x32xf32> -> vector<8x32xf32>
    %c2_40 = arith.constant 2 : index
    %c0_41 = arith.constant 0 : index
    %c0_42 = arith.constant 0 : index
    %41 = vector.load %arg7[%c2_40, %c0_41, %c0_42] : memref<3x1x32xf32, #tpu.memory_space<vmem>>, vector<1x1x32xf32>
    %42 = vector.shape_cast %41 : vector<1x1x32xf32> to vector<1x32xf32>
    %43 = vector.broadcast %42 : vector<1x32xf32> to vector<8x32xf32>
    %44 = arith.addf %40, %43 : vector<8x32xf32>
    %45 = vector.extract_strided_slice %12 {offsets = [0, 0], sizes = [8, 32], strides = [1, 1]} : vector<64x32xf32> to vector<8x32xf32>
    %46 = arith.addf %45, %34 : vector<8x32xf32>
    %47 = arith.negf %46 : vector<8x32xf32>
    %48 = math.exp %47 : vector<8x32xf32>
    %cst_43 = arith.constant 1.000000e+00 : f32
    %49 = vector.broadcast %cst_43 : f32 to vector<8x32xf32>
    %50 = arith.addf %49, %48 : vector<8x32xf32>
    %51 = arith.divf %49, %50 : vector<8x32xf32>
    %52 = vector.extract_strided_slice %23 {offsets = [0, 0], sizes = [8, 32], strides = [1, 1]} : vector<64x32xf32> to vector<8x32xf32>
    %53 = arith.addf %52, %37 : vector<8x32xf32>
    %54 = arith.negf %53 : vector<8x32xf32>
    %55 = math.exp %54 : vector<8x32xf32>
    %cst_44 = arith.constant 1.000000e+00 : f32
    %56 = vector.broadcast %cst_44 : f32 to vector<8x32xf32>
    %57 = arith.addf %56, %55 : vector<8x32xf32>
    %58 = arith.divf %56, %57 : vector<8x32xf32>
    %59 = vector.extract_strided_slice %30 {offsets = [0, 0], sizes = [8, 32], strides = [1, 1]} : vector<64x32xf32> to vector<8x32xf32>
    %60 = arith.mulf %51, %44 : vector<8x32xf32>
    %61 = arith.addf %59, %60 : vector<8x32xf32>
    %62 = math.tanh %61 : vector<8x32xf32>
    %cst_45 = arith.constant 1.000000e+00 : f32
    %63 = vector.broadcast %cst_45 : f32 to vector<8x32xf32>
    %64 = arith.subf %63, %58 : vector<8x32xf32>
    %65 = arith.mulf %64, %62 : vector<8x32xf32>
    %66 = arith.mulf %58, %31 : vector<8x32xf32>
    %67 = arith.addf %65, %66 : vector<8x32xf32>
    %c0_46 = arith.constant 0 : index
    %c0_47 = arith.constant 0 : index
    %c0_48 = arith.constant 0 : index
    %68 = vector.load %arg14[%c0_46, %c0_47, %c0_48] : memref<8x8x32xf32, #tpu.memory_space<vmem>>, vector<1x8x32xf32>
    %69 = vector.shape_cast %68 : vector<1x8x32xf32> to vector<8x32xf32>
    %70 = vector.shape_cast %67 : vector<8x32xf32> to vector<1x8x32xf32>
    tpu.vector_store %arg14[%c0_46, %c0_47, %c0_48], %70 {strides = array<i32>} : memref<8x8x32xf32, #tpu.memory_space<vmem>>, vector<1x8x32xf32>,
    %c0_49 = arith.constant 0 : index
    %c0_50 = arith.constant 0 : index
    %c0_51 = arith.constant 0 : index
    %71 = vector.load %arg5[%c0_49, %c0_50, %c0_51] : memref<3x32x32xf32, #tpu.memory_space<vmem>>, vector<1x32x32xf32>
    %72 = vector.shape_cast %71 : vector<1x32x32xf32> to vector<32x32xf32>
    %cst_52 = arith.constant dense<0.000000e+00> : vector<8x32xf32>
    %73 = tpu.matmul %67, %72, %cst_52 {dimension_numbers = #tpu.dot_dimension_numbers<[1], [0], [0], [1], [0, 0, 1, 1], [], []>} : vector<8x32xf32>, vector<32x32xf32>, vector<8x32xf32> -> vector<8x32xf32>
    %c1_53 = arith.constant 1 : index
    %c0_54 = arith.constant 0 : index
    %c0_55 = arith.constant 0 : index
    %74 = vector.load %arg5[%c1_53, %c0_54, %c0_55] : memref<3x32x32xf32, #tpu.memory_space<vmem>>, vector<1x32x32xf32>
    %75 = vector.shape_cast %74 : vector<1x32x32xf32> to vector<32x32xf32>
    %cst_56 = arith.constant dense<0.000000e+00> : vector<8x32xf32>
    %76 = tpu.matmul %67, %75, %cst_56 {dimension_numbers = #tpu.dot_dimension_numbers<[1], [0], [0], [1], [0, 0, 1, 1], [], []>} : vector<8x32xf32>, vector<32x32xf32>, vector<8x32xf32> -> vector<8x32xf32>
    %c2_57 = arith.constant 2 : index
    %c0_58 = arith.constant 0 : index
    %c0_59 = arith.constant 0 : index
    %77 = vector.load %arg5[%c2_57, %c0_58, %c0_59] : memref<3x32x32xf32, #tpu.memory_space<vmem>>, vector<1x32x32xf32>
    %78 = vector.shape_cast %77 : vector<1x32x32xf32> to vector<32x32xf32>
    %cst_60 = arith.constant dense<0.000000e+00> : vector<8x32xf32>
    %79 = tpu.matmul %67, %78, %cst_60 {dimension_numbers = #tpu.dot_dimension_numbers<[1], [0], [0], [1], [0, 0, 1, 1], [], []>} : vector<8x32xf32>, vector<32x32xf32>, vector<8x32xf32> -> vector<8x32xf32>
    %c2_61 = arith.constant 2 : index
    %c0_62 = arith.constant 0 : index
    %c0_63 = arith.constant 0 : index
    %80 = vector.load %arg7[%c2_61, %c0_62, %c0_63] : memref<3x1x32xf32, #tpu.memory_space<vmem>>, vector<1x1x32xf32>
    %81 = vector.shape_cast %80 : vector<1x1x32xf32> to vector<1x32xf32>
    %82 = vector.broadcast %81 : vector<1x32xf32> to vector<8x32xf32>
    %83 = arith.addf %79, %82 : vector<8x32xf32>
    %84 = vector.extract_strided_slice %12 {offsets = [8, 0], sizes = [8, 32], strides = [1, 1]} : vector<64x32xf32> to vector<8x32xf32>
    %85 = arith.addf %84, %73 : vector<8x32xf32>
    %86 = arith.negf %85 : vector<8x32xf32>
    %87 = math.exp %86 : vector<8x32xf32>
    %cst_64 = arith.constant 1.000000e+00 : f32
    %88 = vector.broadcast %cst_64 : f32 to vector<8x32xf32>
    %89 = arith.addf %88, %87 : vector<8x32xf32>
    %90 = arith.divf %88, %89 : vector<8x32xf32>
    %91 = vector.extract_strided_slice %23 {offsets = [8, 0], sizes = [8, 32], strides = [1, 1]} : vector<64x32xf32> to vector<8x32xf32>
    %92 = arith.addf %91, %76 : vector<8x32xf32>
    %93 = arith.negf %92 : vector<8x32xf32>
    %94 = math.exp %93 : vector<8x32xf32>
    %cst_65 = arith.constant 1.000000e+00 : f32
    %95 = vector.broadcast %cst_65 : f32 to vector<8x32xf32>
    %96 = arith.addf %95, %94 : vector<8x32xf32>
    %97 = arith.divf %95, %96 : vector<8x32xf32>
    %98 = vector.extract_strided_slice %30 {offsets = [8, 0], sizes = [8, 32], strides = [1, 1]} : vector<64x32xf32> to vector<8x32xf32>
    %99 = arith.mulf %90, %83 : vector<8x32xf32>
    %100 = arith.addf %98, %99 : vector<8x32xf32>
    %101 = math.tanh %100 : vector<8x32xf32>
    %cst_66 = arith.constant 1.000000e+00 : f32
    %102 = vector.broadcast %cst_66 : f32 to vector<8x32xf32>
    %103 = arith.subf %102, %97 : vector<8x32xf32>
    %104 = arith.mulf %103, %101 : vector<8x32xf32>
    %105 = arith.mulf %97, %67 : vector<8x32xf32>
    %106 = arith.addf %104, %105 : vector<8x32xf32>
    %c1_67 = arith.constant 1 : index
    %c0_68 = arith.constant 0 : index
    %c0_69 = arith.constant 0 : index
    %107 = vector.load %arg14[%c1_67, %c0_68, %c0_69] : memref<8x8x32xf32, #tpu.memory_space<vmem>>, vector<1x8x32xf32>
    %108 = vector.shape_cast %107 : vector<1x8x32xf32> to vector<8x32xf32>
    %109 = vector.shape_cast %106 : vector<8x32xf32> to vector<1x8x32xf32>
    tpu.vector_store %arg14[%c1_67, %c0_68, %c0_69], %109 {strides = array<i32>} : memref<8x8x32xf32, #tpu.memory_space<vmem>>, vector<1x8x32xf32>,
    %c0_70 = arith.constant 0 : index
    %c0_71 = arith.constant 0 : index
    %c0_72 = arith.constant 0 : index
    %110 = vector.load %arg5[%c0_70, %c0_71, %c0_72] : memref<3x32x32xf32, #tpu.memory_space<vmem>>, vector<1x32x32xf32>
    %111 = vector.shape_cast %110 : vector<1x32x32xf32> to vector<32x32xf32>
    %cst_73 = arith.constant dense<0.000000e+00> : vector<8x32xf32>
    %112 = tpu.matmul %106, %111, %cst_73 {dimension_numbers = #tpu.dot_dimension_numbers<[1], [0], [0], [1], [0, 0, 1, 1], [], []>} : vector<8x32xf32>, vector<32x32xf32>, vector<8x32xf32> -> vector<8x32xf32>
    %c1_74 = arith.constant 1 : index
    %c0_75 = arith.constant 0 : index
    %c0_76 = arith.constant 0 : index
    %113 = vector.load %arg5[%c1_74, %c0_75, %c0_76] : memref<3x32x32xf32, #tpu.memory_space<vmem>>, vector<1x32x32xf32>
    %114 = vector.shape_cast %113 : vector<1x32x32xf32> to vector<32x32xf32>
    %cst_77 = arith.constant dense<0.000000e+00> : vector<8x32xf32>
    %115 = tpu.matmul %106, %114, %cst_77 {dimension_numbers = #tpu.dot_dimension_numbers<[1], [0], [0], [1], [0, 0, 1, 1], [], []>} : vector<8x32xf32>, vector<32x32xf32>, vector<8x32xf32> -> vector<8x32xf32>
    %c2_78 = arith.constant 2 : index
    %c0_79 = arith.constant 0 : index
    %c0_80 = arith.constant 0 : index
    %116 = vector.load %arg5[%c2_78, %c0_79, %c0_80] : memref<3x32x32xf32, #tpu.memory_space<vmem>>, vector<1x32x32xf32>
    %117 = vector.shape_cast %116 : vector<1x32x32xf32> to vector<32x32xf32>
    %cst_81 = arith.constant dense<0.000000e+00> : vector<8x32xf32>
    %118 = tpu.matmul %106, %117, %cst_81 {dimension_numbers = #tpu.dot_dimension_numbers<[1], [0], [0], [1], [0, 0, 1, 1], [], []>} : vector<8x32xf32>, vector<32x32xf32>, vector<8x32xf32> -> vector<8x32xf32>
    %c2_82 = arith.constant 2 : index
    %c0_83 = arith.constant 0 : index
    %c0_84 = arith.constant 0 : index
    %119 = vector.load %arg7[%c2_82, %c0_83, %c0_84] : memref<3x1x32xf32, #tpu.memory_space<vmem>>, vector<1x1x32xf32>
    %120 = vector.shape_cast %119 : vector<1x1x32xf32> to vector<1x32xf32>
    %121 = vector.broadcast %120 : vector<1x32xf32> to vector<8x32xf32>
    %122 = arith.addf %118, %121 : vector<8x32xf32>
    %123 = vector.extract_strided_slice %12 {offsets = [16, 0], sizes = [8, 32], strides = [1, 1]} : vector<64x32xf32> to vector<8x32xf32>
    %124 = arith.addf %123, %112 : vector<8x32xf32>
    %125 = arith.negf %124 : vector<8x32xf32>
    %126 = math.exp %125 : vector<8x32xf32>
    %cst_85 = arith.constant 1.000000e+00 : f32
    %127 = vector.broadcast %cst_85 : f32 to vector<8x32xf32>
    %128 = arith.addf %127, %126 : vector<8x32xf32>
    %129 = arith.divf %127, %128 : vector<8x32xf32>
    %130 = vector.extract_strided_slice %23 {offsets = [16, 0], sizes = [8, 32], strides = [1, 1]} : vector<64x32xf32> to vector<8x32xf32>
    %131 = arith.addf %130, %115 : vector<8x32xf32>
    %132 = arith.negf %131 : vector<8x32xf32>
    %133 = math.exp %132 : vector<8x32xf32>
    %cst_86 = arith.constant 1.000000e+00 : f32
    %134 = vector.broadcast %cst_86 : f32 to vector<8x32xf32>
    %135 = arith.addf %134, %133 : vector<8x32xf32>
    %136 = arith.divf %134, %135 : vector<8x32xf32>
    %137 = vector.extract_strided_slice %30 {offsets = [16, 0], sizes = [8, 32], strides = [1, 1]} : vector<64x32xf32> to vector<8x32xf32>
    %138 = arith.mulf %129, %122 : vector<8x32xf32>
    %139 = arith.addf %137, %138 : vector<8x32xf32>
    %140 = math.tanh %139 : vector<8x32xf32>
    %cst_87 = arith.constant 1.000000e+00 : f32
    %141 = vector.broadcast %cst_87 : f32 to vector<8x32xf32>
    %142 = arith.subf %141, %136 : vector<8x32xf32>
    %143 = arith.mulf %142, %140 : vector<8x32xf32>
    %144 = arith.mulf %136, %106 : vector<8x32xf32>
    %145 = arith.addf %143, %144 : vector<8x32xf32>
    %c2_88 = arith.constant 2 : index
    %c0_89 = arith.constant 0 : index
    %c0_90 = arith.constant 0 : index
    %146 = vector.load %arg14[%c2_88, %c0_89, %c0_90] : memref<8x8x32xf32, #tpu.memory_space<vmem>>, vector<1x8x32xf32>
    %147 = vector.shape_cast %146 : vector<1x8x32xf32> to vector<8x32xf32>
    %148 = vector.shape_cast %145 : vector<8x32xf32> to vector<1x8x32xf32>
    tpu.vector_store %arg14[%c2_88, %c0_89, %c0_90], %148 {strides = array<i32>} : memref<8x8x32xf32, #tpu.memory_space<vmem>>, vector<1x8x32xf32>,
    %c0_91 = arith.constant 0 : index
    %c0_92 = arith.constant 0 : index
    %c0_93 = arith.constant 0 : index
    %149 = vector.load %arg5[%c0_91, %c0_92, %c0_93] : memref<3x32x32xf32, #tpu.memory_space<vmem>>, vector<1x32x32xf32>
    %150 = vector.shape_cast %149 : vector<1x32x32xf32> to vector<32x32xf32>
    %cst_94 = arith.constant dense<0.000000e+00> : vector<8x32xf32>
    %151 = tpu.matmul %145, %150, %cst_94 {dimension_numbers = #tpu.dot_dimension_numbers<[1], [0], [0], [1], [0, 0, 1, 1], [], []>} : vector<8x32xf32>, vector<32x32xf32>, vector<8x32xf32> -> vector<8x32xf32>
    %c1_95 = arith.constant 1 : index
    %c0_96 = arith.constant 0 : index
    %c0_97 = arith.constant 0 : index
    %152 = vector.load %arg5[%c1_95, %c0_96, %c0_97] : memref<3x32x32xf32, #tpu.memory_space<vmem>>, vector<1x32x32xf32>
    %153 = vector.shape_cast %152 : vector<1x32x32xf32> to vector<32x32xf32>
    %cst_98 = arith.constant dense<0.000000e+00> : vector<8x32xf32>
    %154 = tpu.matmul %145, %153, %cst_98 {dimension_numbers = #tpu.dot_dimension_numbers<[1], [0], [0], [1], [0, 0, 1, 1], [], []>} : vector<8x32xf32>, vector<32x32xf32>, vector<8x32xf32> -> vector<8x32xf32>
    %c2_99 = arith.constant 2 : index
    %c0_100 = arith.constant 0 : index
    %c0_101 = arith.constant 0 : index
    %155 = vector.load %arg5[%c2_99, %c0_100, %c0_101] : memref<3x32x32xf32, #tpu.memory_space<vmem>>, vector<1x32x32xf32>
    %156 = vector.shape_cast %155 : vector<1x32x32xf32> to vector<32x32xf32>
    %cst_102 = arith.constant dense<0.000000e+00> : vector<8x32xf32>
    %157 = tpu.matmul %145, %156, %cst_102 {dimension_numbers = #tpu.dot_dimension_numbers<[1], [0], [0], [1], [0, 0, 1, 1], [], []>} : vector<8x32xf32>, vector<32x32xf32>, vector<8x32xf32> -> vector<8x32xf32>
    %c2_103 = arith.constant 2 : index
    %c0_104 = arith.constant 0 : index
    %c0_105 = arith.constant 0 : index
    %158 = vector.load %arg7[%c2_103, %c0_104, %c0_105] : memref<3x1x32xf32, #tpu.memory_space<vmem>>, vector<1x1x32xf32>
    %159 = vector.shape_cast %158 : vector<1x1x32xf32> to vector<1x32xf32>
    %160 = vector.broadcast %159 : vector<1x32xf32> to vector<8x32xf32>
    %161 = arith.addf %157, %160 : vector<8x32xf32>
    %162 = vector.extract_strided_slice %12 {offsets = [24, 0], sizes = [8, 32], strides = [1, 1]} : vector<64x32xf32> to vector<8x32xf32>
    %163 = arith.addf %162, %151 : vector<8x32xf32>
    %164 = arith.negf %163 : vector<8x32xf32>
    %165 = math.exp %164 : vector<8x32xf32>
    %cst_106 = arith.constant 1.000000e+00 : f32
    %166 = vector.broadcast %cst_106 : f32 to vector<8x32xf32>
    %167 = arith.addf %166, %165 : vector<8x32xf32>
    %168 = arith.divf %166, %167 : vector<8x32xf32>
    %169 = vector.extract_strided_slice %23 {offsets = [24, 0], sizes = [8, 32], strides = [1, 1]} : vector<64x32xf32> to vector<8x32xf32>
    %170 = arith.addf %169, %154 : vector<8x32xf32>
    %171 = arith.negf %170 : vector<8x32xf32>
    %172 = math.exp %171 : vector<8x32xf32>
    %cst_107 = arith.constant 1.000000e+00 : f32
    %173 = vector.broadcast %cst_107 : f32 to vector<8x32xf32>
    %174 = arith.addf %173, %172 : vector<8x32xf32>
    %175 = arith.divf %173, %174 : vector<8x32xf32>
    %176 = vector.extract_strided_slice %30 {offsets = [24, 0], sizes = [8, 32], strides = [1, 1]} : vector<64x32xf32> to vector<8x32xf32>
    %177 = arith.mulf %168, %161 : vector<8x32xf32>
    %178 = arith.addf %176, %177 : vector<8x32xf32>
    %179 = math.tanh %178 : vector<8x32xf32>
    %cst_108 = arith.constant 1.000000e+00 : f32
    %180 = vector.broadcast %cst_108 : f32 to vector<8x32xf32>
    %181 = arith.subf %180, %175 : vector<8x32xf32>
    %182 = arith.mulf %181, %179 : vector<8x32xf32>
    %183 = arith.mulf %175, %145 : vector<8x32xf32>
    %184 = arith.addf %182, %183 : vector<8x32xf32>
    %c3 = arith.constant 3 : index
    %c0_109 = arith.constant 0 : index
    %c0_110 = arith.constant 0 : index
    %185 = vector.load %arg14[%c3, %c0_109, %c0_110] : memref<8x8x32xf32, #tpu.memory_space<vmem>>, vector<1x8x32xf32>
    %186 = vector.shape_cast %185 : vector<1x8x32xf32> to vector<8x32xf32>
    %187 = vector.shape_cast %184 : vector<8x32xf32> to vector<1x8x32xf32>
    tpu.vector_store %arg14[%c3, %c0_109, %c0_110], %187 {strides = array<i32>} : memref<8x8x32xf32, #tpu.memory_space<vmem>>, vector<1x8x32xf32>,
    %c0_111 = arith.constant 0 : index
    %c0_112 = arith.constant 0 : index
    %c0_113 = arith.constant 0 : index
    %188 = vector.load %arg5[%c0_111, %c0_112, %c0_113] : memref<3x32x32xf32, #tpu.memory_space<vmem>>, vector<1x32x32xf32>
    %189 = vector.shape_cast %188 : vector<1x32x32xf32> to vector<32x32xf32>
    %cst_114 = arith.constant dense<0.000000e+00> : vector<8x32xf32>
    %190 = tpu.matmul %184, %189, %cst_114 {dimension_numbers = #tpu.dot_dimension_numbers<[1], [0], [0], [1], [0, 0, 1, 1], [], []>} : vector<8x32xf32>, vector<32x32xf32>, vector<8x32xf32> -> vector<8x32xf32>
    %c1_115 = arith.constant 1 : index
    %c0_116 = arith.constant 0 : index
    %c0_117 = arith.constant 0 : index
    %191 = vector.load %arg5[%c1_115, %c0_116, %c0_117] : memref<3x32x32xf32, #tpu.memory_space<vmem>>, vector<1x32x32xf32>
    %192 = vector.shape_cast %191 : vector<1x32x32xf32> to vector<32x32xf32>
    %cst_118 = arith.constant dense<0.000000e+00> : vector<8x32xf32>
    %193 = tpu.matmul %184, %192, %cst_118 {dimension_numbers = #tpu.dot_dimension_numbers<[1], [0], [0], [1], [0, 0, 1, 1], [], []>} : vector<8x32xf32>, vector<32x32xf32>, vector<8x32xf32> -> vector<8x32xf32>
    %c2_119 = arith.constant 2 : index
    %c0_120 = arith.constant 0 : index
    %c0_121 = arith.constant 0 : index
    %194 = vector.load %arg5[%c2_119, %c0_120, %c0_121] : memref<3x32x32xf32, #tpu.memory_space<vmem>>, vector<1x32x32xf32>
    %195 = vector.shape_cast %194 : vector<1x32x32xf32> to vector<32x32xf32>
    %cst_122 = arith.constant dense<0.000000e+00> : vector<8x32xf32>
    %196 = tpu.matmul %184, %195, %cst_122 {dimension_numbers = #tpu.dot_dimension_numbers<[1], [0], [0], [1], [0, 0, 1, 1], [], []>} : vector<8x32xf32>, vector<32x32xf32>, vector<8x32xf32> -> vector<8x32xf32>
    %c2_123 = arith.constant 2 : index
    %c0_124 = arith.constant 0 : index
    %c0_125 = arith.constant 0 : index
    %197 = vector.load %arg7[%c2_123, %c0_124, %c0_125] : memref<3x1x32xf32, #tpu.memory_space<vmem>>, vector<1x1x32xf32>
    %198 = vector.shape_cast %197 : vector<1x1x32xf32> to vector<1x32xf32>
    %199 = vector.broadcast %198 : vector<1x32xf32> to vector<8x32xf32>
    %200 = arith.addf %196, %199 : vector<8x32xf32>
    %201 = vector.extract_strided_slice %12 {offsets = [32, 0], sizes = [8, 32], strides = [1, 1]} : vector<64x32xf32> to vector<8x32xf32>
    %202 = arith.addf %201, %190 : vector<8x32xf32>
    %203 = arith.negf %202 : vector<8x32xf32>
    %204 = math.exp %203 : vector<8x32xf32>
    %cst_126 = arith.constant 1.000000e+00 : f32
    %205 = vector.broadcast %cst_126 : f32 to vector<8x32xf32>
    %206 = arith.addf %205, %204 : vector<8x32xf32>
    %207 = arith.divf %205, %206 : vector<8x32xf32>
    %208 = vector.extract_strided_slice %23 {offsets = [32, 0], sizes = [8, 32], strides = [1, 1]} : vector<64x32xf32> to vector<8x32xf32>
    %209 = arith.addf %208, %193 : vector<8x32xf32>
    %210 = arith.negf %209 : vector<8x32xf32>
    %211 = math.exp %210 : vector<8x32xf32>
    %cst_127 = arith.constant 1.000000e+00 : f32
    %212 = vector.broadcast %cst_127 : f32 to vector<8x32xf32>
    %213 = arith.addf %212, %211 : vector<8x32xf32>
    %214 = arith.divf %212, %213 : vector<8x32xf32>
    %215 = vector.extract_strided_slice %30 {offsets = [32, 0], sizes = [8, 32], strides = [1, 1]} : vector<64x32xf32> to vector<8x32xf32>
    %216 = arith.mulf %207, %200 : vector<8x32xf32>
    %217 = arith.addf %215, %216 : vector<8x32xf32>
    %218 = math.tanh %217 : vector<8x32xf32>
    %cst_128 = arith.constant 1.000000e+00 : f32
    %219 = vector.broadcast %cst_128 : f32 to vector<8x32xf32>
    %220 = arith.subf %219, %214 : vector<8x32xf32>
    %221 = arith.mulf %220, %218 : vector<8x32xf32>
    %222 = arith.mulf %214, %184 : vector<8x32xf32>
    %223 = arith.addf %221, %222 : vector<8x32xf32>
    %c4 = arith.constant 4 : index
    %c0_129 = arith.constant 0 : index
    %c0_130 = arith.constant 0 : index
    %224 = vector.load %arg14[%c4, %c0_129, %c0_130] : memref<8x8x32xf32, #tpu.memory_space<vmem>>, vector<1x8x32xf32>
    %225 = vector.shape_cast %224 : vector<1x8x32xf32> to vector<8x32xf32>
    %226 = vector.shape_cast %223 : vector<8x32xf32> to vector<1x8x32xf32>
    tpu.vector_store %arg14[%c4, %c0_129, %c0_130], %226 {strides = array<i32>} : memref<8x8x32xf32, #tpu.memory_space<vmem>>, vector<1x8x32xf32>,
    %c0_131 = arith.constant 0 : index
    %c0_132 = arith.constant 0 : index
    %c0_133 = arith.constant 0 : index
    %227 = vector.load %arg5[%c0_131, %c0_132, %c0_133] : memref<3x32x32xf32, #tpu.memory_space<vmem>>, vector<1x32x32xf32>
    %228 = vector.shape_cast %227 : vector<1x32x32xf32> to vector<32x32xf32>
    %cst_134 = arith.constant dense<0.000000e+00> : vector<8x32xf32>
    %229 = tpu.matmul %223, %228, %cst_134 {dimension_numbers = #tpu.dot_dimension_numbers<[1], [0], [0], [1], [0, 0, 1, 1], [], []>} : vector<8x32xf32>, vector<32x32xf32>, vector<8x32xf32> -> vector<8x32xf32>
    %c1_135 = arith.constant 1 : index
    %c0_136 = arith.constant 0 : index
    %c0_137 = arith.constant 0 : index
    %230 = vector.load %arg5[%c1_135, %c0_136, %c0_137] : memref<3x32x32xf32, #tpu.memory_space<vmem>>, vector<1x32x32xf32>
    %231 = vector.shape_cast %230 : vector<1x32x32xf32> to vector<32x32xf32>
    %cst_138 = arith.constant dense<0.000000e+00> : vector<8x32xf32>
    %232 = tpu.matmul %223, %231, %cst_138 {dimension_numbers = #tpu.dot_dimension_numbers<[1], [0], [0], [1], [0, 0, 1, 1], [], []>} : vector<8x32xf32>, vector<32x32xf32>, vector<8x32xf32> -> vector<8x32xf32>
    %c2_139 = arith.constant 2 : index
    %c0_140 = arith.constant 0 : index
    %c0_141 = arith.constant 0 : index
    %233 = vector.load %arg5[%c2_139, %c0_140, %c0_141] : memref<3x32x32xf32, #tpu.memory_space<vmem>>, vector<1x32x32xf32>
    %234 = vector.shape_cast %233 : vector<1x32x32xf32> to vector<32x32xf32>
    %cst_142 = arith.constant dense<0.000000e+00> : vector<8x32xf32>
    %235 = tpu.matmul %223, %234, %cst_142 {dimension_numbers = #tpu.dot_dimension_numbers<[1], [0], [0], [1], [0, 0, 1, 1], [], []>} : vector<8x32xf32>, vector<32x32xf32>, vector<8x32xf32> -> vector<8x32xf32>
    %c2_143 = arith.constant 2 : index
    %c0_144 = arith.constant 0 : index
    %c0_145 = arith.constant 0 : index
    %236 = vector.load %arg7[%c2_143, %c0_144, %c0_145] : memref<3x1x32xf32, #tpu.memory_space<vmem>>, vector<1x1x32xf32>
    %237 = vector.shape_cast %236 : vector<1x1x32xf32> to vector<1x32xf32>
    %238 = vector.broadcast %237 : vector<1x32xf32> to vector<8x32xf32>
    %239 = arith.addf %235, %238 : vector<8x32xf32>
    %240 = vector.extract_strided_slice %12 {offsets = [40, 0], sizes = [8, 32], strides = [1, 1]} : vector<64x32xf32> to vector<8x32xf32>
    %241 = arith.addf %240, %229 : vector<8x32xf32>
    %242 = arith.negf %241 : vector<8x32xf32>
    %243 = math.exp %242 : vector<8x32xf32>
    %cst_146 = arith.constant 1.000000e+00 : f32
    %244 = vector.broadcast %cst_146 : f32 to vector<8x32xf32>
    %245 = arith.addf %244, %243 : vector<8x32xf32>
    %246 = arith.divf %244, %245 : vector<8x32xf32>
    %247 = vector.extract_strided_slice %23 {offsets = [40, 0], sizes = [8, 32], strides = [1, 1]} : vector<64x32xf32> to vector<8x32xf32>
    %248 = arith.addf %247, %232 : vector<8x32xf32>
    %249 = arith.negf %248 : vector<8x32xf32>
    %250 = math.exp %249 : vector<8x32xf32>
    %cst_147 = arith.constant 1.000000e+00 : f32
    %251 = vector.broadcast %cst_147 : f32 to vector<8x32xf32>
    %252 = arith.addf %251, %250 : vector<8x32xf32>
    %253 = arith.divf %251, %252 : vector<8x32xf32>
    %254 = vector.extract_strided_slice %30 {offsets = [40, 0], sizes = [8, 32], strides = [1, 1]} : vector<64x32xf32> to vector<8x32xf32>
    %255 = arith.mulf %246, %239 : vector<8x32xf32>
    %256 = arith.addf %254, %255 : vector<8x32xf32>
    %257 = math.tanh %256 : vector<8x32xf32>
    %cst_148 = arith.constant 1.000000e+00 : f32
    %258 = vector.broadcast %cst_148 : f32 to vector<8x32xf32>
    %259 = arith.subf %258, %253 : vector<8x32xf32>
    %260 = arith.mulf %259, %257 : vector<8x32xf32>
    %261 = arith.mulf %253, %223 : vector<8x32xf32>
    %262 = arith.addf %260, %261 : vector<8x32xf32>
    %c5 = arith.constant 5 : index
    %c0_149 = arith.constant 0 : index
    %c0_150 = arith.constant 0 : index
    %263 = vector.load %arg14[%c5, %c0_149, %c0_150] : memref<8x8x32xf32, #tpu.memory_space<vmem>>, vector<1x8x32xf32>
    %264 = vector.shape_cast %263 : vector<1x8x32xf32> to vector<8x32xf32>
    %265 = vector.shape_cast %262 : vector<8x32xf32> to vector<1x8x32xf32>
    tpu.vector_store %arg14[%c5, %c0_149, %c0_150], %265 {strides = array<i32>} : memref<8x8x32xf32, #tpu.memory_space<vmem>>, vector<1x8x32xf32>,
    %c0_151 = arith.constant 0 : index
    %c0_152 = arith.constant 0 : index
    %c0_153 = arith.constant 0 : index
    %266 = vector.load %arg5[%c0_151, %c0_152, %c0_153] : memref<3x32x32xf32, #tpu.memory_space<vmem>>, vector<1x32x32xf32>
    %267 = vector.shape_cast %266 : vector<1x32x32xf32> to vector<32x32xf32>
    %cst_154 = arith.constant dense<0.000000e+00> : vector<8x32xf32>
    %268 = tpu.matmul %262, %267, %cst_154 {dimension_numbers = #tpu.dot_dimension_numbers<[1], [0], [0], [1], [0, 0, 1, 1], [], []>} : vector<8x32xf32>, vector<32x32xf32>, vector<8x32xf32> -> vector<8x32xf32>
    %c1_155 = arith.constant 1 : index
    %c0_156 = arith.constant 0 : index
    %c0_157 = arith.constant 0 : index
    %269 = vector.load %arg5[%c1_155, %c0_156, %c0_157] : memref<3x32x32xf32, #tpu.memory_space<vmem>>, vector<1x32x32xf32>
    %270 = vector.shape_cast %269 : vector<1x32x32xf32> to vector<32x32xf32>
    %cst_158 = arith.constant dense<0.000000e+00> : vector<8x32xf32>
    %271 = tpu.matmul %262, %270, %cst_158 {dimension_numbers = #tpu.dot_dimension_numbers<[1], [0], [0], [1], [0, 0, 1, 1], [], []>} : vector<8x32xf32>, vector<32x32xf32>, vector<8x32xf32> -> vector<8x32xf32>
    %c2_159 = arith.constant 2 : index
    %c0_160 = arith.constant 0 : index
    %c0_161 = arith.constant 0 : index
    %272 = vector.load %arg5[%c2_159, %c0_160, %c0_161] : memref<3x32x32xf32, #tpu.memory_space<vmem>>, vector<1x32x32xf32>
    %273 = vector.shape_cast %272 : vector<1x32x32xf32> to vector<32x32xf32>
    %cst_162 = arith.constant dense<0.000000e+00> : vector<8x32xf32>
    %274 = tpu.matmul %262, %273, %cst_162 {dimension_numbers = #tpu.dot_dimension_numbers<[1], [0], [0], [1], [0, 0, 1, 1], [], []>} : vector<8x32xf32>, vector<32x32xf32>, vector<8x32xf32> -> vector<8x32xf32>
    %c2_163 = arith.constant 2 : index
    %c0_164 = arith.constant 0 : index
    %c0_165 = arith.constant 0 : index
    %275 = vector.load %arg7[%c2_163, %c0_164, %c0_165] : memref<3x1x32xf32, #tpu.memory_space<vmem>>, vector<1x1x32xf32>
    %276 = vector.shape_cast %275 : vector<1x1x32xf32> to vector<1x32xf32>
    %277 = vector.broadcast %276 : vector<1x32xf32> to vector<8x32xf32>
    %278 = arith.addf %274, %277 : vector<8x32xf32>
    %279 = vector.extract_strided_slice %12 {offsets = [48, 0], sizes = [8, 32], strides = [1, 1]} : vector<64x32xf32> to vector<8x32xf32>
    %280 = arith.addf %279, %268 : vector<8x32xf32>
    %281 = arith.negf %280 : vector<8x32xf32>
    %282 = math.exp %281 : vector<8x32xf32>
    %cst_166 = arith.constant 1.000000e+00 : f32
    %283 = vector.broadcast %cst_166 : f32 to vector<8x32xf32>
    %284 = arith.addf %283, %282 : vector<8x32xf32>
    %285 = arith.divf %283, %284 : vector<8x32xf32>
    %286 = vector.extract_strided_slice %23 {offsets = [48, 0], sizes = [8, 32], strides = [1, 1]} : vector<64x32xf32> to vector<8x32xf32>
    %287 = arith.addf %286, %271 : vector<8x32xf32>
    %288 = arith.negf %287 : vector<8x32xf32>
    %289 = math.exp %288 : vector<8x32xf32>
    %cst_167 = arith.constant 1.000000e+00 : f32
    %290 = vector.broadcast %cst_167 : f32 to vector<8x32xf32>
    %291 = arith.addf %290, %289 : vector<8x32xf32>
    %292 = arith.divf %290, %291 : vector<8x32xf32>
    %293 = vector.extract_strided_slice %30 {offsets = [48, 0], sizes = [8, 32], strides = [1, 1]} : vector<64x32xf32> to vector<8x32xf32>
    %294 = arith.mulf %285, %278 : vector<8x32xf32>
    %295 = arith.addf %293, %294 : vector<8x32xf32>
    %296 = math.tanh %295 : vector<8x32xf32>
    %cst_168 = arith.constant 1.000000e+00 : f32
    %297 = vector.broadcast %cst_168 : f32 to vector<8x32xf32>
    %298 = arith.subf %297, %292 : vector<8x32xf32>
    %299 = arith.mulf %298, %296 : vector<8x32xf32>
    %300 = arith.mulf %292, %262 : vector<8x32xf32>
    %301 = arith.addf %299, %300 : vector<8x32xf32>
    %c6 = arith.constant 6 : index
    %c0_169 = arith.constant 0 : index
    %c0_170 = arith.constant 0 : index
    %302 = vector.load %arg14[%c6, %c0_169, %c0_170] : memref<8x8x32xf32, #tpu.memory_space<vmem>>, vector<1x8x32xf32>
    %303 = vector.shape_cast %302 : vector<1x8x32xf32> to vector<8x32xf32>
    %304 = vector.shape_cast %301 : vector<8x32xf32> to vector<1x8x32xf32>
    tpu.vector_store %arg14[%c6, %c0_169, %c0_170], %304 {strides = array<i32>} : memref<8x8x32xf32, #tpu.memory_space<vmem>>, vector<1x8x32xf32>,
    %c0_171 = arith.constant 0 : index
    %c0_172 = arith.constant 0 : index
    %c0_173 = arith.constant 0 : index
    %305 = vector.load %arg5[%c0_171, %c0_172, %c0_173] : memref<3x32x32xf32, #tpu.memory_space<vmem>>, vector<1x32x32xf32>
    %306 = vector.shape_cast %305 : vector<1x32x32xf32> to vector<32x32xf32>
    %cst_174 = arith.constant dense<0.000000e+00> : vector<8x32xf32>
    %307 = tpu.matmul %301, %306, %cst_174 {dimension_numbers = #tpu.dot_dimension_numbers<[1], [0], [0], [1], [0, 0, 1, 1], [], []>} : vector<8x32xf32>, vector<32x32xf32>, vector<8x32xf32> -> vector<8x32xf32>
    %c1_175 = arith.constant 1 : index
    %c0_176 = arith.constant 0 : index
    %c0_177 = arith.constant 0 : index
    %308 = vector.load %arg5[%c1_175, %c0_176, %c0_177] : memref<3x32x32xf32, #tpu.memory_space<vmem>>, vector<1x32x32xf32>
    %309 = vector.shape_cast %308 : vector<1x32x32xf32> to vector<32x32xf32>
    %cst_178 = arith.constant dense<0.000000e+00> : vector<8x32xf32>
    %310 = tpu.matmul %301, %309, %cst_178 {dimension_numbers = #tpu.dot_dimension_numbers<[1], [0], [0], [1], [0, 0, 1, 1], [], []>} : vector<8x32xf32>, vector<32x32xf32>, vector<8x32xf32> -> vector<8x32xf32>
    %c2_179 = arith.constant 2 : index
    %c0_180 = arith.constant 0 : index
    %c0_181 = arith.constant 0 : index
    %311 = vector.load %arg5[%c2_179, %c0_180, %c0_181] : memref<3x32x32xf32, #tpu.memory_space<vmem>>, vector<1x32x32xf32>
    %312 = vector.shape_cast %311 : vector<1x32x32xf32> to vector<32x32xf32>
    %cst_182 = arith.constant dense<0.000000e+00> : vector<8x32xf32>
    %313 = tpu.matmul %301, %312, %cst_182 {dimension_numbers = #tpu.dot_dimension_numbers<[1], [0], [0], [1], [0, 0, 1, 1], [], []>} : vector<8x32xf32>, vector<32x32xf32>, vector<8x32xf32> -> vector<8x32xf32>
    %c2_183 = arith.constant 2 : index
    %c0_184 = arith.constant 0 : index
    %c0_185 = arith.constant 0 : index
    %314 = vector.load %arg7[%c2_183, %c0_184, %c0_185] : memref<3x1x32xf32, #tpu.memory_space<vmem>>, vector<1x1x32xf32>
    %315 = vector.shape_cast %314 : vector<1x1x32xf32> to vector<1x32xf32>
    %316 = vector.broadcast %315 : vector<1x32xf32> to vector<8x32xf32>
    %317 = arith.addf %313, %316 : vector<8x32xf32>
    %318 = vector.extract_strided_slice %12 {offsets = [56, 0], sizes = [8, 32], strides = [1, 1]} : vector<64x32xf32> to vector<8x32xf32>
    %319 = arith.addf %318, %307 : vector<8x32xf32>
    %320 = arith.negf %319 : vector<8x32xf32>
    %321 = math.exp %320 : vector<8x32xf32>
    %cst_186 = arith.constant 1.000000e+00 : f32
    %322 = vector.broadcast %cst_186 : f32 to vector<8x32xf32>
    %323 = arith.addf %322, %321 : vector<8x32xf32>
    %324 = arith.divf %322, %323 : vector<8x32xf32>
    %325 = vector.extract_strided_slice %23 {offsets = [56, 0], sizes = [8, 32], strides = [1, 1]} : vector<64x32xf32> to vector<8x32xf32>
    %326 = arith.addf %325, %310 : vector<8x32xf32>
    %327 = arith.negf %326 : vector<8x32xf32>
    %328 = math.exp %327 : vector<8x32xf32>
    %cst_187 = arith.constant 1.000000e+00 : f32
    %329 = vector.broadcast %cst_187 : f32 to vector<8x32xf32>
    %330 = arith.addf %329, %328 : vector<8x32xf32>
    %331 = arith.divf %329, %330 : vector<8x32xf32>
    %332 = vector.extract_strided_slice %30 {offsets = [56, 0], sizes = [8, 32], strides = [1, 1]} : vector<64x32xf32> to vector<8x32xf32>
    %333 = arith.mulf %324, %317 : vector<8x32xf32>
    %334 = arith.addf %332, %333 : vector<8x32xf32>
    %335 = math.tanh %334 : vector<8x32xf32>
    %cst_188 = arith.constant 1.000000e+00 : f32
    %336 = vector.broadcast %cst_188 : f32 to vector<8x32xf32>
    %337 = arith.subf %336, %331 : vector<8x32xf32>
    %338 = arith.mulf %337, %335 : vector<8x32xf32>
    %339 = arith.mulf %331, %301 : vector<8x32xf32>
    %340 = arith.addf %338, %339 : vector<8x32xf32>
    %c7 = arith.constant 7 : index
    %c0_189 = arith.constant 0 : index
    %c0_190 = arith.constant 0 : index
    %341 = vector.load %arg14[%c7, %c0_189, %c0_190] : memref<8x8x32xf32, #tpu.memory_space<vmem>>, vector<1x8x32xf32>
    %342 = vector.shape_cast %341 : vector<1x8x32xf32> to vector<8x32xf32>
    %343 = vector.shape_cast %340 : vector<8x32xf32> to vector<1x8x32xf32>
    tpu.vector_store %arg14[%c7, %c0_189, %c0_190], %343 {strides = array<i32>} : memref<8x8x32xf32, #tpu.memory_space<vmem>>, vector<1x8x32xf32>,
    %c0_191 = arith.constant 0 : index
    %c0_192 = arith.constant 0 : index
    %344 = vector.load %arg12[%c0_191, %c0_192] : memref<8x32xf32, #tpu.memory_space<vmem>>, vector<8x32xf32>
    tpu.vector_store %arg12[%c0_191, %c0_192], %340 {strides = array<i32>} : memref<8x32xf32, #tpu.memory_space<vmem>>, vector<8x32xf32>,
    %c0_193 = arith.constant 0 : index
    %c0_194 = arith.constant 0 : index
    %c0_195 = arith.constant 0 : index
    %345 = vector.load %arg2[%c0_193, %c0_194, %c0_195] : memref<8x10x32xf32, #tpu.memory_space<vmem>>, vector<8x10x32xf32>
    %c0_196 = arith.constant 0 : index
    %c0_197 = arith.constant 0 : index
    %c0_198 = arith.constant 0 : index
    %346 = vector.load %arg14[%c0_196, %c0_197, %c0_198] : memref<8x8x32xf32, #tpu.memory_space<vmem>>, vector<8x8x32xf32>
    %347 = tpu.transpose %346, [1, 0, 2] : vector<8x8x32xf32> -> vector<8x8x32xf32>
    "tpu.trace_start"() <{level = 10 : i32, message = "bth,bsh->bts"}> : () -> ()
    %cst_199 = arith.constant dense<0.000000e+00> : vector<8x8x10xf32>
    %348 = tpu.matmul %347, %345, %cst_199 {dimension_numbers = #tpu.dot_dimension_numbers<[2], [2], [1], [1], [0, 0, 0, 1, 1, 1], [0], [0]>} : vector<8x8x32xf32>, vector<8x10x32xf32>, vector<8x8x10xf32> -> vector<8x8x10xf32>
    "tpu.trace_stop"() : () -> ()
    %cst_200 = arith.constant dense<0xFF800000> : vector<8x8xf32>
    %349 = vector.multi_reduction <maximumf>, %348, %cst_200 [2] : vector<8x8x10xf32> to vector<8x8xf32>
    %350 = vector.shape_cast %349 : vector<8x8xf32> to vector<8x8x1xf32>
    %351 = vector.broadcast %350 : vector<8x8x1xf32> to vector<8x8x10xf32>
    %352 = arith.subf %348, %351 : vector<8x8x10xf32>
    %353 = math.exp %352 : vector<8x8x10xf32>
    %cst_201 = arith.constant dense<0.000000e+00> : vector<8x8xf32>
    %354 = vector.multi_reduction <add>, %353, %cst_201 [2] : vector<8x8x10xf32> to vector<8x8xf32>
    %355 = vector.shape_cast %354 : vector<8x8xf32> to vector<8x8x1xf32>
    %356 = tpu.reciprocal %355 : vector<8x8x1xf32> -> vector<8x8x1xf32>
    %357 = vector.broadcast %356 : vector<8x8x1xf32> to vector<8x8x10xf32>
    %358 = arith.mulf %353, %357 : vector<8x8x10xf32>
    %c0_202 = arith.constant 0 : index
    %c0_203 = arith.constant 0 : index
    %c0_204 = arith.constant 0 : index
    %359 = vector.load %arg13[%c0_202, %c0_203, %c0_204] : memref<8x8x10xf32, #tpu.memory_space<vmem>>, vector<8x8x10xf32>
    tpu.vector_store %arg13[%c0_202, %c0_203, %c0_204], %358 {strides = array<i32>} : memref<8x8x10xf32, #tpu.memory_space<vmem>>, vector<8x8x10xf32>,
    "tpu.trace_start"() <{level = 10 : i32, message = "bts,bsh->bth"}> : () -> ()
    %cst_205 = arith.constant dense<0.000000e+00> : vector<8x8x32xf32>
    %360 = tpu.matmul %358, %345, %cst_205 {dimension_numbers = #tpu.dot_dimension_numbers<[2], [1], [1], [2], [0, 0, 0, 1, 1, 2], [0], [0]>} : vector<8x8x10xf32>, vector<8x10x32xf32>, vector<8x8x32xf32> -> vector<8x8x32xf32>
    "tpu.trace_stop"() : () -> ()
    %361 = vector.shape_cast %347 : vector<8x8x32xf32> to vector<64x32xf32>
    %362 = vector.shape_cast %360 : vector<8x8x32xf32> to vector<64x32xf32>
    %c0_206 = arith.constant 0 : index
    %c0_207 = arith.constant 0 : index
    %363 = vector.load %arg8[%c0_206, %c0_207] : memref<32x128xf32, #tpu.memory_space<vmem>>, vector<32x128xf32>
    %cst_208 = arith.constant dense<0.000000e+00> : vector<64x128xf32>
    %364 = tpu.matmul %361, %363, %cst_208 {dimension_numbers = #tpu.dot_dimension_numbers<[1], [0], [0], [1], [0, 0, 1, 1], [], []>} : vector<64x32xf32>, vector<32x128xf32>, vector<64x128xf32> -> vector<64x128xf32>
    %c0_209 = arith.constant 0 : index
    %c0_210 = arith.constant 0 : index
    %365 = vector.load %arg9[%c0_209, %c0_210] : memref<32x128xf32, #tpu.memory_space<vmem>>, vector<32x128xf32>
    %cst_211 = arith.constant dense<0.000000e+00> : vector<64x128xf32>
    %366 = tpu.matmul %362, %365, %cst_211 {dimension_numbers = #tpu.dot_dimension_numbers<[1], [0], [0], [1], [0, 0, 1, 1], [], []>} : vector<64x32xf32>, vector<32x128xf32>, vector<64x128xf32> -> vector<64x128xf32>
    %367 = arith.addf %364, %366 : vector<64x128xf32>
    %c0_212 = arith.constant 0 : index
    %c0_213 = arith.constant 0 : index
    %368 = vector.load %arg10[%c0_212, %c0_213] : memref<1x128xf32, #tpu.memory_space<vmem>>, vector<1x128xf32>
    %369 = vector.broadcast %368 : vector<1x128xf32> to vector<64x128xf32>
    %370 = arith.addf %367, %369 : vector<64x128xf32>
    %371 = vector.shape_cast %370 : vector<64x128xf32> to vector<8x8x128xf32>
    %c0_214 = arith.constant 0 : index
    %c0_215 = arith.constant 0 : index
    %c0_216 = arith.constant 0 : index
    %372 = vector.load %arg11[%c0_214, %c0_215, %c0_216] : memref<8x8x128xf32, #tpu.memory_space<vmem>>, vector<8x8x128xf32>
    tpu.vector_store %arg11[%c0_214, %c0_215, %c0_216], %371 {strides = array<i32>} : memref<8x8x128xf32, #tpu.memory_space<vmem>>, vector<8x8x128xf32>,
    return
  }
  func.func @transform_0(%arg0: i32) -> (i32, i32, i32) {
    %c0_i32 = arith.constant 0 : i32
    %c0_i32_0 = arith.constant 0 : i32
    %c0_i32_1 = arith.constant 0 : i32
    return %c0_i32, %arg0, %c0_i32_0 : i32, i32, i32
  }
  func.func @transform_1(%arg0: i32) -> (i32, i32, i32) {
    %c0_i32 = arith.constant 0 : i32
    %c0_i32_0 = arith.constant 0 : i32
    %c0_i32_1 = arith.constant 0 : i32
    return %arg0, %c0_i32, %c0_i32_0 : i32, i32, i32
  }
  func.func @transform_2(%arg0: i32) -> (i32, i32) {
    %c0_i32 = arith.constant 0 : i32
    %c0_i32_0 = arith.constant 0 : i32
    return %arg0, %c0_i32 : i32, i32
  }
  func.func @transform_3(%arg0: i32) -> (i32, i32, i32) {
    %c0_i32 = arith.constant 0 : i32
    %c0_i32_0 = arith.constant 0 : i32
    %c0_i32_1 = arith.constant 0 : i32
    %c0_i32_2 = arith.constant 0 : i32
    return %c0_i32, %c0_i32_0, %c0_i32_1 : i32, i32, i32
  }
  func.func @transform_4(%arg0: i32) -> (i32, i32, i32) {
    %c0_i32 = arith.constant 0 : i32
    %c0_i32_0 = arith.constant 0 : i32
    %c0_i32_1 = arith.constant 0 : i32
    %c0_i32_2 = arith.constant 0 : i32
    return %c0_i32, %c0_i32_0, %c0_i32_1 : i32, i32, i32
  }
  func.func @transform_5(%arg0: i32) -> (i32, i32, i32) {
    %c0_i32 = arith.constant 0 : i32
    %c0_i32_0 = arith.constant 0 : i32
    %c0_i32_1 = arith.constant 0 : i32
    %c0_i32_2 = arith.constant 0 : i32
    return %c0_i32, %c0_i32_0, %c0_i32_1 : i32, i32, i32
  }
  func.func @transform_6(%arg0: i32) -> (i32, i32, i32) {
    %c0_i32 = arith.constant 0 : i32
    %c0_i32_0 = arith.constant 0 : i32
    %c0_i32_1 = arith.constant 0 : i32
    %c0_i32_2 = arith.constant 0 : i32
    return %c0_i32, %c0_i32_0, %c0_i32_1 : i32, i32, i32
  }
  func.func @transform_7(%arg0: i32) -> (i32, i32) {
    %c0_i32 = arith.constant 0 : i32
    %c0_i32_0 = arith.constant 0 : i32
    %c0_i32_1 = arith.constant 0 : i32
    return %c0_i32, %c0_i32_0 : i32, i32
  }
  func.func @transform_8(%arg0: i32) -> (i32, i32) {
    %c0_i32 = arith.constant 0 : i32
    %c0_i32_0 = arith.constant 0 : i32
    %c0_i32_1 = arith.constant 0 : i32
    return %c0_i32, %c0_i32_0 : i32, i32
  }
  func.func @transform_9(%arg0: i32) -> (i32, i32) {
    %c0_i32 = arith.constant 0 : i32
    %c0_i32_0 = arith.constant 0 : i32
    %c0_i32_1 = arith.constant 0 : i32
    return %c0_i32, %c0_i32_0 : i32, i32
  }
  func.func @transform_10(%arg0: i32) -> (i32, i32, i32) {
    %c0_i32 = arith.constant 0 : i32
    %c0_i32_0 = arith.constant 0 : i32
    %c0_i32_1 = arith.constant 0 : i32
    return %arg0, %c0_i32, %c0_i32_0 : i32, i32, i32
  }
  func.func @transform_11(%arg0: i32) -> (i32, i32) {
    %c0_i32 = arith.constant 0 : i32
    %c0_i32_0 = arith.constant 0 : i32
    return %arg0, %c0_i32 : i32, i32
  }
  func.func @transform_12(%arg0: i32) -> (i32, i32, i32) {
    %c0_i32 = arith.constant 0 : i32
    %c0_i32_0 = arith.constant 0 : i32
    %c0_i32_1 = arith.constant 0 : i32
    return %arg0, %c0_i32, %c0_i32_0 : i32, i32, i32
  }
}

</mosaic_0001>

<bundles_post_ra>
// kernel: tpu_custom_call.1
= control target key start
LH: loop header
LB: loop body
LE: loop exit
PB: predicated region body
PF: predicated region fallthrough
CT: control target
= control target key end

     0   :  { %18 = vsyncpa [#allocation4], 0  ;;  %s6628_s0 = inlined_call_operand.vmem [shape: f32[8,8,16], index: 0, kind: input, shape index: {}]   ;;  %s6629_s1 = inlined_call_operand.vmem [shape: f32[8,10,32], index: 1, kind: input, shape index: {}]   ;;  %s6630_s2 = inlined_call_operand.hbm [shape: f32[8,32], index: 2, kind: input, shape index: {}]   ;;  %s6631_s3 = inlined_call_operand.vmem [shape: f32[3,16,32], index: 3, kind: input, shape index: {}]   ;;  %s6632_s4 = inlined_call_operand.vmem [shape: f32[3,32,32], index: 4, kind: input, shape index: {}]   ;;  %s6633_s5 = inlined_call_operand.vmem [shape: f32[3,1,32], index: 5, kind: input, shape index: {}]   ;;  %s6634_s6 = inlined_call_operand.vmem [shape: f32[3,1,32], index: 6, kind: input, shape index: {}]   ;;  %s6635_s7 = inlined_call_operand.hbm [shape: f32[32,128], index: 7, kind: input, shape index: {}]   ;;  %s6636_s8 = inlined_call_operand.hbm [shape: f32[32,128], index: 8, kind: input, shape index: {}]   ;;  %s6637_s9 = inlined_call_operand.vmem [shape: f32[1,128], index: 9, kind: input, shape index: {}]   ;;  %s6638_s10 = inlined_call_operand.hbm [shape: f32[8,8,128], index: 10, kind: output, shape index: {0}]   ;;  %s6639_s11 = inlined_call_operand.hbm [shape: f32[8,32], index: 11, kind: output, shape index: {1}]   ;;  %s6640_s12 = inlined_call_operand.hbm [shape: f32[8,8,10], index: 12, kind: output, shape index: {2}]  }
   0x1   :  { %19 = vsyncpa [#allocation7], 0 }
   0x2   :  { %20 = vsyncpa [#allocation5], 0 }
   0x3   :  { %21 = vsyncpa [#allocation11], 0  ;;  %s5757_s21 = smov [#allocation6]   ;;  %s5617_s25 = scalar_lea.hbm %s6635_s7, 512 }
   0x4   :  { %s49_s22 = sshll.u32 %s5757_s21, 4  ;;  %p5618_p0 = scmp.ne.s32.totalorder %s6635_s7, %s5617_s25  ;;  %s50_s22 = int_to_ptr.vmem [resolvable:$true] %s49_s22 }
   0x5   :  { %p5621_p1 = scmp.lt.u32.totalorder %s5617_s25, %s6635_s7 }
   0x7   :  { %p5623_p2 = pnand %p5621_p1, %p5618_p0 }
   0x9   :  { %5626 = shalt.err (!%p5623_p2)
}
   0xa   :  { %s5627_s30 = scalar_lea.vmem %s50_s22, 512  ;;  %p5632_p4 = scmp.lt.s32.totalorder %s50_s22, %s50_s22 }
   0xb   :  { %p5628_p3 = scmp.ne.s32.totalorder %s50_s22, %s5627_s30  ;;  %p5633_p5 = scmp.lt.s32.totalorder %s5627_s30, %s5627_s30 }
   0xd   :  { %p5634_p6 = por %p5633_p5, %p5632_p4 }
   0xf   :  { %p5635_p7 = pnand %p5634_p6, %p5628_p3 }
  0x11   :  { %5638 = shalt.err (!%p5635_p7)
}
  0x12   :  { %s5758_s13 = smov 128   ;;  %s5759_s14 = smov 8  }
  0x13   :  { %55 = dma.hbm_to_vmem [thread:$0]  %s6635_s7, 512, %s50_s22, [#allocation7], %s5758_s13, %s5758_s13, %s5759_s14  }
  0x14   :  { %s5760_s17 = smov [#allocation3]   ;;  %s5761_s19 = smov [#allocation8]  }
  0x15   :  { %s32_s18 = sshll.u32 %s5760_s17, 4  ;;  %s61_s20 = sshll.u32 %s5761_s19, 4  ;;  %s33_s18 = int_to_ptr.vmem [resolvable:$true] %s32_s18  ;;  %s62_s20 = int_to_ptr.vmem [resolvable:$true] %s61_s20 }
  0x16   :  { %s5639_s24 = scalar_lea.hbm %s6630_s2, 128 }
  0x17   :  { %p5640_p8 = scmp.ne.s32.totalorder %s6630_s2, %s5639_s24  ;;  %p5643_p9 = scmp.lt.u32.totalorder %s5639_s24, %s6630_s2 }
  0x19   :  { %p5645_p10 = pnand %p5643_p9, %p5640_p8 }
  0x1b   :  { %5648 = shalt.err (!%p5645_p10)
}
  0x1c   :  { %s5649_s7 = scalar_lea.vmem %s33_s18, 128  ;;  %p5654_p12 = scmp.lt.s32.totalorder %s33_s18, %s33_s18 }
  0x1d   :  { %p5650_p11 = scmp.ne.s32.totalorder %s33_s18, %s5649_s7  ;;  %p5655_p13 = scmp.lt.s32.totalorder %s5649_s7, %s5649_s7 }
  0x1f   :  { %p5656_p0 = por %p5655_p13, %p5654_p12 }
  0x21   :  { %p5657_p1 = pnand %p5656_p0, %p5650_p11 }
  0x23   :  { %5660 = shalt.err (!%p5657_p1)
}
  0x24   :  { %35 = dma.hbm_to_vmem [thread:$0]  %s6630_s2, 128, %s33_s18, [#allocation4]  }
  0x25   :  { %s5661_s16 = scalar_lea.hbm %s6636_s8, 512 }
  0x26   :  { %p5662_p2 = scmp.ne.s32.totalorder %s6636_s8, %s5661_s16  ;;  %p5665_p3 = scmp.lt.u32.totalorder %s5661_s16, %s6636_s8 }
  0x28   :  { %p5667_p4 = pnand %p5665_p3, %p5662_p2 }
  0x2a   :  { %5670 = shalt.err (!%p5667_p4)
}
  0x2b   :  { %s5671_s24 = scalar_lea.vmem %s62_s20, 512  ;;  %p5676_p6 = scmp.lt.s32.totalorder %s62_s20, %s62_s20 }
  0x2c   :  { %p5672_p5 = scmp.ne.s32.totalorder %s62_s20, %s5671_s24  ;;  %p5677_p7 = scmp.lt.s32.totalorder %s5671_s24, %s5671_s24 }
  0x2e   :  { %p5678_p8 = por %p5677_p7, %p5676_p6 }
  0x30   :  { %p5679_p9 = pnand %p5678_p8, %p5672_p5 }
  0x32   :  { %5682 = shalt.err (!%p5679_p9)
}
  0x33   :  { %67 = dma.hbm_to_vmem [thread:$0]  %s6636_s8, 512, %s62_s20, [#allocation7], %s5758_s13, %s5758_s13, %s5759_s14  }
  0x34   :  { %5749 = dma.done.wait [#allocation4], 128  }
  0x35   :  { %5750 = vsyncadd [#allocation4], 4294967168 }
  0x36   :  { %5751 = dma.done.wait [#allocation7], 1024  }
  0x37   :  { %5752 = vsyncadd [#allocation7], 4294966272  ;;  %vm96_vm0 = vcmask 130048   ;;  %v87_v0 = vld [vmem:[%s6631_s3] sm:$0xff]  ;;  %v88_v1 = vld [vmem:[%s6631_s3 + $0x8] sm:$0xff]  ;;  %v5762_v16 = vmov 0.0|0.0  }
  0x38   :  { %v79_v2 = vld [vmem:[%s6628_s0] sm:$0xff]  ;;  %v5235_v3 = vpack.c.bf16 %v88_v1, %v87_v0  ;;  %v4346_v4 = vld [vmem:[%s6631_s3 + $0x10] sm:$0xff]  ;;  %v4347_v5 = vld [vmem:[%s6631_s3 + $0x18] sm:$0xff]  ;;  %vm5763_vm1 = vmmov 0   ;;  %v5764_v32 = vmov 0.0   ;;  %vm494_vm2 = vcmask 261120  }
  0x39   :  { %4775 = vmatprep.mubr.msk.f32.mxu1 %vm96_vm0, %v79_v2  ;;  %4807 = vmatprep.mubr.msk.f32.mxu0 %vm96_vm0, %v79_v2  ;;  %v5239_v6 = vpack.c.bf16 %v4347_v5, %v4346_v4  ;;  %v80_v7 = vld [vmem:[%s6628_s0 + $0x8] sm:$0xff]  ;;  %v81_v8 = vld [vmem:[%s6628_s0 + $0x10] sm:$0xff]  ;;  %v4360_v9 = vld [vmem:[%s6631_s3 + $0x20] sm:$0xff]  ;;  %vm3326_vm4 = vcmask 80896   ;;  %vm3426_vm5 = vcmask 1041408   ;;  %vm5767_vm6 = vmmov 1  }
  0x3a   :  { %5236 = vmatprep.subr.bf16.mxu1 %v5235_v3  ;;  %v4361_v10 = vld [vmem:[%s6631_s3 + $0x28] sm:$0xff]  ;;  %v82_v11 = vld [vmem:[%s6628_s0 + $0x18] sm:$0xff]  ;;  %v4378_v13 = vld [vmem:[%s6632_s4 + $0x40] sm:$0xff] }
  0x3b   :  { %5238 = vmatpush3.bf16.msra.mxu1 %v5235_v3  ;;  %v5243_v12 = vpack.c.bf16 %v4361_v10, %v4360_v9  ;;  %v4379_v14 = vld [vmem:[%s6632_s4 + $0x48] sm:$0xff]  ;;  %v83_v15 = vld [vmem:[%s6628_s0 + $0x20] sm:$0xff]  ;;  %v85_v19 = vld [vmem:[%s6628_s0 + $0x30] sm:$0xff] }
  0x3c   :  { %5240 = vmatprep.subr.bf16.mxu1 %v5239_v6  ;;  %v5923_v17 = vpack.c.bf16 %v4379_v14, %v4378_v13  ;;  %v84_v18 = vld [vmem:[%s6628_s0 + $0x28] sm:$0xff]  ;;  %v4380_v20 = vld [vmem:[%s6632_s4 + $0x50] sm:$0xff]  ;;  %v4381_v21 = vld [vmem:[%s6632_s4 + $0x58] sm:$0xff] }
  0x3d   :  { %5244 = vmatprep.subr.bf16.mxu0 %v5243_v12  ;;  %v86_v22 = vld [vmem:[%s6628_s0 + $0x38] sm:$0xff]  ;;  %v5947_v23 = vpack.c.bf16 %v4381_v21, %v4380_v20  ;;  %v490_v24 = vld [vmem:[%s6632_s4] sm:$0xff]  ;;  %v491_v25 = vld [vmem:[%s6632_s4 + $0x8] sm:$0xff] }
  0x3e   :  { %4776 = vmatmul.mubr.msk.f32.vlgmr.msra.gmra.mrb[0].mxu1 %vm96_vm0, %v80_v7  ;;  %5246 = vmatpush3.bf16.msra.mxu0 %v5243_v12  ;;  %v5960_v26 = vpack.c.bf16 %v491_v25, %v490_v24  ;;  %v492_v27 = vld [vmem:[%s6632_s4 + $0x10] sm:$0xff]  ;;  %v493_v28 = vld [vmem:[%s6632_s4 + $0x18] sm:$0xff]  ;;  %v4373_v30 = vld [vmem:[%s6632_s4 + $0x20] sm:$0xff] }
  0x3f   :  { %5242 = vmatpush3.bf16.msra.mxu1 %v5239_v6  ;;  %4778 = vmatprep.mubr.msk.f32.mxu1 %vm96_vm0, %v81_v8  ;;  %v5975_v29 = vpack.c.bf16 %v493_v28, %v492_v27  ;;  %v4374_v31 = vld [vmem:[%s6632_s4 + $0x28] sm:$0xff]  ;;  %v5991_v33 = vld [vmem:[#allocation3] sm:$0xff]  ;;  %v4375_v35 = vld [vmem:[%s6632_s4 + $0x30] sm:$0xff] }
  0x40   :  { %5247 = vmatprep.subr.bf16.mxu1 %v5762_v16  ;;  %5259 = vmatprep.subr.bf16.mxu0 %v5762_v16  ;;  %v5993_v34 = vpack.c.bf16 %v4374_v31, %v4373_v30  ;;  %v4376_v36 = vld [vmem:[%s6632_s4 + $0x38] sm:$0xff]  ;;  %v4336_v38 = vld [vmem:[%s6633_s5] ss:$0 sm:$0xff]  ;;  %v6046_v47 = vld [vmem:[%s6633_s5 + $0x2] ss:$0 sm:$0xff] }
  0x41   :  { %4808 = vmatmul.mubr.msk.f32.vlgmr.msra.gmra.mrb[0].mxu0 %vm96_vm0, %v80_v7  ;;  %v6007_v37 = vpack.c.bf16 %v4376_v36, %v4375_v35  ;;  %v6038_v40 = vld [vmem:[%s6634_s6] ss:$0 sm:$0xff]  ;;  %v4349_v4 = vld [vmem:[%s6633_s5 + $0x1] ss:$0 sm:$0xff]  ;;  %vm6307_vm3 = vmpackc.low %vm494_vm2, %vm494_vm2 }
  0x42   :  { %4779 = vmatmul.mubr.msk.f32.gmra.mrb[2].mxu1 %vm96_vm0, %v82_v11  ;;  %5261 = vmatpush3.bf16.msra.mxu0 %v5923_v17  ;;  %vm6493_vm7 = vmpackc.low %vm3426_vm5, %vm5767_vm6 }
  0x43   :  { %4781 = vmatprep.mubr.msk.f32.mxu1 %vm96_vm0, %v83_v15  ;;  %4810 = vmatprep.mubr.msk.f32.mxu0 %vm96_vm0, %v81_v8 }
  0x44   :  { %5262 = vmatprep.subr.bf16.mxu0 %v5762_v16 }
  0x45   :  { %4811 = vmatmul.mubr.msk.f32.gmra.mrb[2].mxu0 %vm96_vm0, %v82_v11 }
  0x46   :  { %4782 = vmatmul.mubr.msk.f32.gmra.mrb[4].mxu1 %vm96_vm0, %v84_v18  ;;  %4813 = vmatprep.mubr.msk.f32.mxu0 %vm96_vm0, %v83_v15 }
  0x47   :  { %4784 = vmatprep.mubr.msk.f32.mxu1 %vm96_vm0, %v85_v19  ;;  %5264 = vmatpush3.bf16.msra.mxu0 %v5947_v23 }
  0x48   :  { %5271 = vmatprep.subr.bf16.mxu0 %v5762_v16 }
  0x49   :  { %4814 = vmatmul.mubr.msk.f32.gmra.mrb[4].mxu0 %vm96_vm0, %v84_v18 }
  0x4a   :  { %4785 = vmatmul.mubr.msk.f32.gmra.mrb[6].mxu1 %vm96_vm0, %v86_v22  ;;  %4816 = vmatprep.mubr.msk.f32.mxu0 %vm96_vm0, %v85_v19 }
  0x4b   :  { %4791 = vmatprep.mubr.msk.f32.mxu1 %vm96_vm0, %v79_v2 }
  0x4d   :  { %4817 = vmatmul.mubr.msk.f32.gmra.mrb[6].mxu0 %vm96_vm0, %v86_v22 }
  0x4e   :  { %4792 = vmatmul.mubr.msk.f32.vlgmr.msra.gmra.mrb[8].mxu1 %vm96_vm0, %v80_v7  ;;  %4849 = vmatprep.mubr.msk.f32.mxu0 %vm5763_vm1, %v5764_v32 }
  0x4f   :  { %5249 = vmatpush3.bf16.msra.mxu1 %v5960_v26  ;;  %4794 = vmatprep.mubr.msk.f32.mxu1 %vm96_vm0, %v81_v8  ;;  %v4359_v8 = vld [vmem:[%s6634_s6 + $0x1] ss:$0 sm:$0xff] }
  0x50   :  { %5250 = vmatprep.subr.bf16.mxu1 %v5762_v16 }
  0x51   :  { %4850 = vmatmul.mubr.msk.f32.vlgmr.msra.gmra.mrb[8].mxu0 %vm494_vm2, %v5991_v33 }
  0x52   :  { %4795 = vmatmul.mubr.msk.f32.gmra.mrb[10].mxu1 %vm96_vm0, %v82_v11  ;;  %5273 = vmatpush3.bf16.msra.mxu0 %v5993_v34 }
  0x53   :  { %4797 = vmatprep.mubr.msk.f32.mxu1 %vm96_vm0, %v83_v15  ;;  %5252 = vmatpush3.bf16.msra.mxu1 %v5975_v29 }
  0x54   :  { %5253 = vmatprep.subr.bf16.mxu1 %v5762_v16  ;;  %5274 = vmatprep.subr.bf16.mxu0 %v5762_v16 }
  0x55   :  { %4871 = vmatprep.mubr.msk.f32.mxu0 %vm5763_vm1, %v5764_v32 }
  0x56   :  { %4798 = vmatmul.mubr.msk.f32.gmra.mrb[12].mxu1 %vm96_vm0, %v84_v18  ;;  %5276 = vmatpush3.bf16.msra.mxu0 %v6007_v37 }
  0x57   :  { %4800 = vmatprep.mubr.msk.f32.mxu1 %vm96_vm0, %v85_v19  ;;  %5283 = vmatprep.subr.bf16.mxu0 %v5762_v16 }
  0x5a   :  { %4801 = vmatmul.mubr.msk.f32.gmra.mrb[14].mxu1 %vm96_vm0, %v86_v22 }
  0x5b   :  { %4827 = vmatprep.mubr.msk.f32.mxu1 %vm5763_vm1, %v5764_v32 }
  0x5e   :  { %4828 = vmatmul.mubr.msk.f32.vlgmr.msra.gmra.mrb[16].mxu1 %vm494_vm2, %v5991_v33 }
  0x5f   :  { %5255 = vmatpush3.bf16.msra.mxu1 %v5993_v34  ;;  %4838 = vmatprep.mubr.msk.f32.mxu1 %vm5763_vm1, %v5764_v32 }
  0x60   :  { %5256 = vmatprep.subr.bf16.mxu1 %v5762_v16 }
  0x63   :  { %5258 = vmatpush3.bf16.msra.mxu1 %v6007_v37 }
  0x64   :  { %5265 = vmatprep.subr.bf16.mxu1 %v5762_v16 }
  0x66   :  { %4839 = vmatmul.mubr.msk.f32.vlgmr.msra.gmra.mrb[18].mxu1 %vm494_vm2, %v5991_v33 }
  0x67   :  { %5267 = vmatpush3.bf16.msra.mxu1 %v5960_v26  ;;  %4860 = vmatprep.mubr.msk.f32.mxu1 %vm5763_vm1, %v5764_v32 }
  0x68   :  { %5268 = vmatprep.subr.bf16.mxu1 %v5762_v16 }
  0x6b   :  { %5270 = vmatpush3.bf16.msra.mxu1 %v5975_v29 }
  0x6c   :  { %5277 = vmatprep.subr.bf16.mxu1 %v5762_v16 }
 0x111   :  { %v4777_v39 = vpop.f32.mrb[0].mxu1 }
 0x112   :  { %v193_v41 = vadd.f32 %v4777_v39, %v4336_v38  ;;  %v187_v42 = vpop.f32.mrb[1].mxu1 }
 0x114   :  { %v6041_v43 = vadd.f32 %v6038_v40, %v193_v41  ;;  %v4809_v49 = vpop.f32.mrb[0].mxu0 }
 0x115   :  { %v4780_v44 = vpop.f32.mrb[2].mxu1  ;;  %v6052_v52 = vadd.f32 %v4809_v49, %v6046_v47  ;;  %v6054_v53 = vpop.f32.mrb[1].mxu0 }
 0x116   :  { %v203_v45 = vadd.f32 %v4780_v44, %v4336_v38  ;;  %v197_v46 = vpop.f32.mrb[3].mxu1 }
 0x117   :  { %v198_v48 = vadd.f32 %v4336_v38, %v197_v46 }
 0x118   :  { %v6049_v50 = vadd.f32 %v6038_v40, %v203_v45  ;;  %v4812_v58 = vpop.f32.mrb[2].mxu0  ;;  %v188_v45 = vadd.f32 %v4336_v38, %v187_v42 }
 0x119   :  { %v4783_v51 = vpop.f32.mrb[4].mxu1  ;;  %v6057_v54 = vadd.f32 %v6038_v40, %v198_v48  ;;  %v6063_v61 = vadd.f32 %v4812_v58, %v6046_v47  ;;  %v460_v62 = vpop.f32.mrb[3].mxu0 }
 0x11a   :  { %v213_v55 = vadd.f32 %v4783_v51, %v4336_v38  ;;  %v207_v56 = vpop.f32.mrb[5].mxu1  ;;  %v6069_v2 = vadd.f32 %v6046_v47, %v460_v62 }
 0x11b   :  { %v208_v57 = vadd.f32 %v4336_v38, %v207_v56 }
 0x11c   :  { %v6060_v59 = vadd.f32 %v6038_v40, %v213_v55  ;;  %v4815_v5 = vpop.f32.mrb[4].mxu0 }
 0x11d   :  { %v4786_v60 = vpop.f32.mrb[6].mxu1  ;;  %v6066_v63 = vadd.f32 %v6038_v40, %v208_v57  ;;  %v6081_v9 = vadd.f32 %v4815_v5, %v6046_v47  ;;  %v470_v10 = vpop.f32.mrb[5].mxu0  ;;  %v233_v57 = vadd.f32 %v6038_v40, %v188_v45 }
 0x11e   :  { %v223_v0 = vadd.f32 %v4786_v60, %v4336_v38  ;;  %v217_v1 = vpop.f32.mrb[7].mxu1  ;;  %v6087_v14 = vadd.f32 %v6046_v47, %v470_v10 }
 0x11f   :  { %v218_v3 = vadd.f32 %v4336_v38, %v217_v1 }
 0x120   :  { %v6075_v6 = vadd.f32 %v6038_v40, %v223_v0  ;;  %v4818_v15 = vpop.f32.mrb[6].mxu0 }
 0x121   :  { %v4793_v7 = vpop.f32.mrb[8].mxu1  ;;  %v6084_v11 = vadd.f32 %v6038_v40, %v218_v3  ;;  %v6092_v20 = vadd.f32 %v4818_v15, %v6046_v47  ;;  %v480_v21 = vpop.f32.mrb[7].mxu0  ;;  %v6113_v40 = vld [vmem:[%s6634_s6 + $0x2] ss:$0 sm:$0xff] }
 0x122   :  { %v324_v12 = vadd.f32 %v4793_v7, %v4349_v4  ;;  %v318_v13 = vpop.f32.mrb[9].mxu1  ;;  %v6095_v25 = vadd.f32 %v6046_v47, %v480_v21 }
 0x123   :  { %v319_v3 = vadd.f32 %v4349_v4, %v318_v13 }
 0x124   :  { %v6089_v18 = vadd.f32 %v4359_v8, %v324_v12  ;;  %v722_v28 = vpop.f32.mrb[8].mxu0 }
 0x125   :  { %v4796_v19 = vpop.f32.mrb[10].mxu1  ;;  %v4851_v35 = vpop.f32.mrb[9].mxu0  ;;  %v365_v38 = vadd.f32 %v4359_v8, %v319_v3 }
 0x126   :  { %v334_v22 = vadd.f32 %v4796_v19, %v4349_v4  ;;  %v328_v24 = vpop.f32.mrb[11].mxu1 }
 0x127   :  { %v329_v27 = vadd.f32 %v4349_v4, %v328_v24 }
 0x128   :  { %v6097_v30 = vadd.f32 %v4359_v8, %v334_v22 }
 0x129   :  { %v4799_v31 = vpop.f32.mrb[12].mxu1  ;;  %v6099_v36 = vadd.f32 %v4359_v8, %v329_v27 }
 0x12a   :  { %v344_v39 = vadd.f32 %v4799_v31, %v4349_v4  ;;  %v338_v41 = vpop.f32.mrb[13].mxu1 }
 0x12b   :  { %v339_v44 = vadd.f32 %v4349_v4, %v338_v41 }
 0x12c   :  { %v6101_v46 = vadd.f32 %v4359_v8, %v344_v39 }
 0x12d   :  { %v4802_v48 = vpop.f32.mrb[14].mxu1  ;;  %v6103_v49 = vadd.f32 %v4359_v8, %v339_v44 }
 0x12e   :  { %v354_v51 = vadd.f32 %v4802_v48, %v4349_v4  ;;  %v348_v55 = vpop.f32.mrb[15].mxu1 }
 0x12f   :  { %v349_v56 = vadd.f32 %v4349_v4, %v348_v55  ;;  %v723_v4 = vadd.f32 %v6113_v40, %v722_v28 }
 0x130   :  { %v6106_v58 = vadd.f32 %v4359_v8, %v354_v51 }
 0x131   :  { %v564_v60 = vpop.f32.mrb[16].mxu1  ;;  %v6108_v62 = vadd.f32 %v4359_v8, %v349_v56  ;;  %v451_v8 = vadd.f32 %v6046_v47, %v6054_v53 }
 0x132   :  { %v726_v0 = vadd.f32 %v564_v60, %v233_v57  ;;  %v4829_v1 = vpop.f32.mrb[17].mxu1 }
 0x134   :  { %v4385_v5 = vmul.f32 -1.442695, %v726_v0 }
 0x136   :  { %5505 = vpow2.f32 %v4385_v5 }
 0x139   :  { %v639_v42 = vpop.f32.mrb[18].mxu1 }
 0x13a   :  { %v733_v7 = vadd.f32 %v639_v42, %v365_v38  ;;  %v4840_v10 = vpop.f32.mrb[19].mxu1 }
 0x13c   :  { %v4386_v12 = vmul.f32 -1.442695, %v733_v7 }
 0x13e   :  { %5507 = vpow2.f32 %v4386_v12 }
 0x140   :  { %v5506_v15 = vpop.eup %5505 }
 0x141   :  { %v730_v19 = vadd.f32 1.0, %v5506_v15 }
 0x143   :  { %5509 = vrcp.f32 %v730_v19 }
 0x148   :  { %v5508_v21 = vpop.eup %5507 }
 0x149   :  { %v737_v22 = vadd.f32 1.0, %v5508_v21 }
 0x14b   :  { %5511 = vrcp.f32 %v737_v22 }
 0x14d   :  { %v5510_v13 = vpop.eup %5509 }
 0x14e   :  { %v740_v24 = vmul.f32 %v5510_v13, %v723_v4 }
 0x150   :  { %v741_v27 = vadd.f32 %v740_v24, %v451_v8 }
 0x152   :  { %5513 = vtanh.f32 %v741_v27 }
 0x155   :  { %v5512_v31 = vpop.eup %5511 }
 0x156   :  { %v743_v35 = vsub.f32 1.0, %v5512_v31  ;;  %v745_v44 = vmul.f32 %v5512_v31, %v5991_v33 }
 0x15c   :  { %v5514_v39 = vpop.eup %5513 }
 0x15d   :  { %v744_v41 = vmul.f32 %v5514_v39, %v743_v35 }
 0x15f   :  { %v746_v45 = vadd.f32 %v745_v44, %v744_v41 }
 0x161   :  { %747 = vst.msk [vmem:[#allocation2] sm:$0xff] %vm494_vm2, %v746_v45  ;;  %4861 = vmatmul.mubr.msk.f32.vlgmr.msra.gmra.mrb[20].mxu1 %vm494_vm2, %v746_v45  ;;  %4872 = vmatmul.mubr.msk.f32.vlgmr.msra.gmra.mrb[10].mxu0 %vm494_vm2, %v746_v45 }
 0x162   :  { %5279 = vmatpush3.bf16.msra.mxu1 %v5923_v17  ;;  %4882 = vmatprep.mubr.msk.f32.mxu1 %vm5763_vm1, %v5764_v32 }
 0x163   :  { %5280 = vmatprep.subr.bf16.mxu1 %v5762_v16  ;;  %5285 = vmatpush3.bf16.msra.mxu0 %v5960_v26 }
 0x164   :  { %5286 = vmatprep.subr.bf16.mxu0 %v5762_v16  ;;  %4893 = vmatprep.mubr.msk.f32.mxu0 %vm5763_vm1, %v5764_v32 }
 0x166   :  { %5282 = vmatpush3.bf16.msra.mxu1 %v5947_v23 }
 0x167   :  { %5289 = vmatprep.subr.bf16.mxu1 %v5762_v16  ;;  %5288 = vmatpush3.bf16.msra.mxu0 %v5975_v29 }
 0x168   :  { %5295 = vmatprep.subr.bf16.mxu0 %v5762_v16 }
 0x169   :  { %4883 = vmatmul.mubr.msk.f32.vlgmr.msra.gmra.mrb[22].mxu1 %vm494_vm2, %v746_v45 }
 0x16a   :  { %5291 = vmatpush3.bf16.msra.mxu1 %v5993_v34  ;;  %4904 = vmatprep.mubr.msk.f32.mxu1 %vm5763_vm1, %v5764_v32 }
 0x16b   :  { %5292 = vmatprep.subr.bf16.mxu1 %v5762_v16 }
 0x16e   :  { %5294 = vmatpush3.bf16.msra.mxu1 %v6007_v37 }
 0x16f   :  { %5301 = vmatprep.subr.bf16.mxu1 %v5762_v16 }
 0x234   :  { %v821_v33 = vpop.f32.mrb[20].mxu1  ;;  %v895_v47 = vpop.f32.mrb[10].mxu0 }
 0x235   :  { %v980_v53 = vadd.f32 %v821_v33, %v6041_v43  ;;  %v987_v28 = vadd.f32 %v895_v47, %v6089_v18  ;;  %v4862_v48 = vpop.f32.mrb[21].mxu1  ;;  %v4873_v51 = vpop.f32.mrb[11].mxu0 }
 0x237   :  { %v4400_v55 = vmul.f32 -1.442695, %v980_v53  ;;  %v4401_v56 = vmul.f32 -1.442695, %v987_v28 }
 0x239   :  { %5515 = vpow2.f32 %v4400_v55 }
 0x23a   :  { %5517 = vpow2.f32 %v4401_v56 }
 0x23c   :  { %v976_v57 = vpop.f32.mrb[22].mxu1 }
 0x23d   :  { %v4884_v60 = vpop.f32.mrb[23].mxu1  ;;  %v977_v38 = vadd.f32 %v6113_v40, %v976_v57 }
 0x243   :  { %v5516_v0 = vpop.eup %5515 }
 0x244   :  { %v984_v1 = vadd.f32 1.0, %v5516_v0  ;;  %v5518_v3 = vpop.eup %5517 }
 0x245   :  { %v991_v5 = vadd.f32 1.0, %v5518_v3 }
 0x246   :  { %5519 = vrcp.f32 %v984_v1 }
 0x247   :  { %5521 = vrcp.f32 %v991_v5 }
 0x250   :  { %v5520_v42 = vpop.eup %5519 }
 0x251   :  { %v994_v43 = vmul.f32 %v5520_v42, %v977_v38  ;;  %v5522_v7 = vpop.eup %5521 }
 0x252   :  { %v997_v10 = vsub.f32 1.0, %v5522_v7  ;;  %v999_v19 = vmul.f32 %v5522_v7, %v746_v45 }
 0x253   :  { %v995_v18 = vadd.f32 %v994_v43, %v6052_v52 }
 0x255   :  { %5523 = vtanh.f32 %v995_v18 }
 0x25f   :  { %v5524_v12 = vpop.eup %5523 }
 0x260   :  { %v998_v15 = vmul.f32 %v5524_v12, %v997_v10 }
 0x262   :  { %v1000_v21 = vadd.f32 %v999_v19, %v998_v15 }
 0x264   :  { %1002 = vst.msk [vmem:[#allocation2 + $0x8] sm:$0xff] %vm494_vm2, %v1000_v21  ;;  %4894 = vmatmul.mubr.msk.f32.vlgmr.msra.gmra.mrb[12].mxu0 %vm494_vm2, %v1000_v21  ;;  %4905 = vmatmul.mubr.msk.f32.vlgmr.msra.gmra.mrb[24].mxu1 %vm494_vm2, %v1000_v21 }
 0x265   :  { %5297 = vmatpush3.bf16.msra.mxu0 %v5923_v17  ;;  %4915 = vmatprep.mubr.msk.f32.mxu0 %vm5763_vm1, %v5764_v32 }
 0x266   :  { %5298 = vmatprep.subr.bf16.mxu0 %v5762_v16  ;;  %5303 = vmatpush3.bf16.msra.mxu1 %v5960_v26 }
 0x267   :  { %5304 = vmatprep.subr.bf16.mxu1 %v5762_v16  ;;  %4926 = vmatprep.mubr.msk.f32.mxu1 %vm5763_vm1, %v5764_v32 }
 0x269   :  { %5300 = vmatpush3.bf16.msra.mxu0 %v5947_v23 }
 0x26a   :  { %5307 = vmatprep.subr.bf16.mxu0 %v5762_v16  ;;  %5306 = vmatpush3.bf16.msra.mxu1 %v5975_v29 }
 0x26b   :  { %5313 = vmatprep.subr.bf16.mxu1 %v5762_v16 }
 0x26c   :  { %4916 = vmatmul.mubr.msk.f32.vlgmr.msra.gmra.mrb[14].mxu0 %vm494_vm2, %v1000_v21 }
 0x26d   :  { %5309 = vmatpush3.bf16.msra.mxu0 %v5993_v34  ;;  %4937 = vmatprep.mubr.msk.f32.mxu0 %vm5763_vm1, %v5764_v32 }
 0x26e   :  { %5310 = vmatprep.subr.bf16.mxu0 %v5762_v16 }
 0x271   :  { %5312 = vmatpush3.bf16.msra.mxu0 %v6007_v37 }
 0x272   :  { %5319 = vmatprep.subr.bf16.mxu0 %v5762_v16 }
 0x337   :  { %v1076_v52 = vpop.f32.mrb[12].mxu0  ;;  %v1150_v22 = vpop.f32.mrb[24].mxu1 }
 0x338   :  { %v1235_v4 = vadd.f32 %v1076_v52, %v6057_v54  ;;  %v1242_v13 = vadd.f32 %v1150_v22, %v6099_v36  ;;  %v4895_v8 = vpop.f32.mrb[13].mxu0  ;;  %v4906_v24 = vpop.f32.mrb[25].mxu1 }
 0x33a   :  { %v4415_v27 = vmul.f32 -1.442695, %v1235_v4  ;;  %v4416_v31 = vmul.f32 -1.442695, %v1242_v13 }
 0x33c   :  { %5525 = vpow2.f32 %v4415_v27 }
 0x33d   :  { %5527 = vpow2.f32 %v4416_v31 }
 0x33f   :  { %v1231_v35 = vpop.f32.mrb[14].mxu0 }
 0x340   :  { %v4917_v39 = vpop.f32.mrb[15].mxu0  ;;  %v1232_v47 = vadd.f32 %v6113_v40, %v1231_v35 }
 0x346   :  { %v5526_v41 = vpop.eup %5525 }
 0x347   :  { %v1239_v44 = vadd.f32 1.0, %v5526_v41  ;;  %v5528_v45 = vpop.eup %5527 }
 0x348   :  { %v1246_v33 = vadd.f32 1.0, %v5528_v45 }
 0x349   :  { %5529 = vrcp.f32 %v1239_v44 }
 0x34a   :  { %5531 = vrcp.f32 %v1246_v33 }
 0x353   :  { %v5530_v53 = vpop.eup %5529 }
 0x354   :  { %v1249_v54 = vmul.f32 %v5530_v53, %v1232_v47  ;;  %v5532_v28 = vpop.eup %5531 }
 0x355   :  { %v1252_v48 = vsub.f32 1.0, %v5532_v28  ;;  %v1254_v56 = vmul.f32 %v5532_v28, %v1000_v21 }
 0x356   :  { %v1250_v36 = vadd.f32 %v1249_v54, %v6069_v2 }
 0x358   :  { %5533 = vtanh.f32 %v1250_v36 }
 0x362   :  { %v5534_v51 = vpop.eup %5533 }
 0x363   :  { %v1253_v55 = vmul.f32 %v5534_v51, %v1252_v48 }
 0x365   :  { %v1255_v57 = vadd.f32 %v1254_v56, %v1253_v55 }
 0x367   :  { %1257 = vst.msk [vmem:[#allocation2 + $0x10] sm:$0xff] %vm494_vm2, %v1255_v57  ;;  %4927 = vmatmul.mubr.msk.f32.vlgmr.msra.gmra.mrb[26].mxu1 %vm494_vm2, %v1255_v57  ;;  %4938 = vmatmul.mubr.msk.f32.vlgmr.msra.gmra.mrb[16].mxu0 %vm494_vm2, %v1255_v57 }
 0x368   :  { %5315 = vmatpush3.bf16.msra.mxu1 %v5923_v17  ;;  %4948 = vmatprep.mubr.msk.f32.mxu1 %vm5763_vm1, %v5764_v32 }
 0x369   :  { %5316 = vmatprep.subr.bf16.mxu1 %v5762_v16  ;;  %5321 = vmatpush3.bf16.msra.mxu0 %v5960_v26 }
 0x36a   :  { %5322 = vmatprep.subr.bf16.mxu0 %v5762_v16  ;;  %4959 = vmatprep.mubr.msk.f32.mxu0 %vm5763_vm1, %v5764_v32 }
 0x36c   :  { %5318 = vmatpush3.bf16.msra.mxu1 %v5947_v23 }
 0x36d   :  { %5325 = vmatprep.subr.bf16.mxu1 %v5762_v16  ;;  %5324 = vmatpush3.bf16.msra.mxu0 %v5975_v29 }
 0x36e   :  { %5331 = vmatprep.subr.bf16.mxu0 %v5762_v16 }
 0x36f   :  { %4949 = vmatmul.mubr.msk.f32.vlgmr.msra.gmra.mrb[28].mxu1 %vm494_vm2, %v1255_v57 }
 0x370   :  { %5327 = vmatpush3.bf16.msra.mxu1 %v5993_v34  ;;  %4970 = vmatprep.mubr.msk.f32.mxu1 %vm5763_vm1, %v5764_v32 }
 0x371   :  { %5328 = vmatprep.subr.bf16.mxu1 %v5762_v16 }
 0x374   :  { %5330 = vmatpush3.bf16.msra.mxu1 %v6007_v37 }
 0x375   :  { %5337 = vmatprep.subr.bf16.mxu1 %v5762_v16 }
 0x43a   :  { %v1331_v2 = vpop.f32.mrb[26].mxu1  ;;  %v1405_v60 = vpop.f32.mrb[16].mxu0 }
 0x43b   :  { %v1490_v0 = vadd.f32 %v1331_v2, %v6049_v50  ;;  %v1497_v1 = vadd.f32 %v1405_v60, %v6097_v30  ;;  %v4928_v3 = vpop.f32.mrb[27].mxu1  ;;  %v4939_v5 = vpop.f32.mrb[17].mxu0 }
 0x43d   :  { %v4430_v38 = vmul.f32 -1.442695, %v1490_v0  ;;  %v4431_v42 = vmul.f32 -1.442695, %v1497_v1 }
 0x43f   :  { %5535 = vpow2.f32 %v4430_v38 }
 0x440   :  { %5537 = vpow2.f32 %v4431_v42 }
 0x442   :  { %v1486_v43 = vpop.f32.mrb[28].mxu1 }
 0x443   :  { %v4950_v18 = vpop.f32.mrb[29].mxu1  ;;  %v1487_v19 = vadd.f32 %v6113_v40, %v1486_v43 }
 0x449   :  { %v5536_v7 = vpop.eup %5535 }
 0x44a   :  { %v1494_v10 = vadd.f32 1.0, %v5536_v7  ;;  %v5538_v12 = vpop.eup %5537 }
 0x44b   :  { %v1501_v15 = vadd.f32 1.0, %v5538_v12 }
 0x44c   :  { %5539 = vrcp.f32 %v1494_v10 }
 0x44d   :  { %5541 = vrcp.f32 %v1501_v15 }
 0x456   :  { %v5540_v21 = vpop.eup %5539 }
 0x457   :  { %v1504_v50 = vmul.f32 %v5540_v21, %v1487_v19  ;;  %v5542_v52 = vpop.eup %5541 }
 0x458   :  { %v1507_v22 = vsub.f32 1.0, %v5542_v52  ;;  %v1509_v8 = vmul.f32 %v5542_v52, %v1255_v57 }
 0x459   :  { %v1505_v30 = vadd.f32 %v1504_v50, %v6063_v61 }
 0x45b   :  { %5543 = vtanh.f32 %v1505_v30 }
 0x465   :  { %v5544_v4 = vpop.eup %5543 }
 0x466   :  { %v1508_v13 = vmul.f32 %v5544_v4, %v1507_v22 }
 0x468   :  { %v1510_v24 = vadd.f32 %v1509_v8, %v1508_v13  ;;  %v2279_v8 = vld [vmem:[%s6632_s4 + $0x8] sm:$0xff] }
 0x46a   :  { %1512 = vst.msk [vmem:[#allocation2 + $0x18] sm:$0xff] %vm494_vm2, %v1510_v24  ;;  %4960 = vmatmul.mubr.msk.f32.vlgmr.msra.gmra.mrb[18].mxu0 %vm494_vm2, %v1510_v24  ;;  %4971 = vmatmul.mubr.msk.f32.vlgmr.msra.gmra.mrb[30].mxu1 %vm494_vm2, %v1510_v24 }
 0x46b   :  { %5333 = vmatpush3.bf16.msra.mxu0 %v5923_v17  ;;  %4981 = vmatprep.mubr.msk.f32.mxu0 %vm5763_vm1, %v5764_v32 }
 0x46c   :  { %5334 = vmatprep.subr.bf16.mxu0 %v5762_v16  ;;  %5339 = vmatpush3.bf16.msra.mxu1 %v5960_v26 }
 0x46d   :  { %5340 = vmatprep.subr.bf16.mxu1 %v5762_v16  ;;  %4992 = vmatprep.mubr.msk.f32.mxu1 %vm5763_vm1, %v5764_v32 }
 0x46f   :  { %5336 = vmatpush3.bf16.msra.mxu0 %v5947_v23 }
 0x470   :  { %5343 = vmatprep.subr.bf16.mxu0 %v5762_v16  ;;  %5342 = vmatpush3.bf16.msra.mxu1 %v5975_v29 }
 0x471   :  { %5349 = vmatprep.subr.bf16.mxu1 %v5762_v16 }
 0x472   :  { %4982 = vmatmul.mubr.msk.f32.vlgmr.msra.gmra.mrb[20].mxu0 %vm494_vm2, %v1510_v24 }
 0x473   :  { %5345 = vmatpush3.bf16.msra.mxu0 %v5993_v34  ;;  %5003 = vmatprep.mubr.msk.f32.mxu0 %vm5763_vm1, %v5764_v32 }
 0x474   :  { %5346 = vmatprep.subr.bf16.mxu0 %v5762_v16 }
 0x477   :  { %5348 = vmatpush3.bf16.msra.mxu0 %v6007_v37 }
 0x478   :  { %5355 = vmatprep.subr.bf16.mxu0 %v5762_v16 }
 0x53d   :  { %v1586_v61 = vpop.f32.mrb[18].mxu0  ;;  %v1660_v27 = vpop.f32.mrb[30].mxu1 }
 0x53e   :  { %v1745_v31 = vadd.f32 %v1586_v61, %v6066_v63  ;;  %v1752_v35 = vadd.f32 %v1660_v27, %v6103_v49  ;;  %v4961_v39 = vpop.f32.mrb[19].mxu0  ;;  %v4972_v41 = vpop.f32.mrb[31].mxu1  ;;  %v2281_v61 = vld [vmem:[%s6632_s4 + $0x18] sm:$0xff] }
 0x540   :  { %v4445_v44 = vmul.f32 -1.442695, %v1745_v31  ;;  %v4446_v45 = vmul.f32 -1.442695, %v1752_v35 }
 0x542   :  { %5545 = vpow2.f32 %v4445_v44 }
 0x543   :  { %5547 = vpow2.f32 %v4446_v45 }
 0x545   :  { %v1741_v33 = vpop.f32.mrb[20].mxu0 }
 0x546   :  { %v4983_v47 = vpop.f32.mrb[21].mxu0  ;;  %v1742_v48 = vadd.f32 %v6113_v40, %v1741_v33 }
 0x54c   :  { %v5546_v53 = vpop.eup %5545 }
 0x54d   :  { %v1749_v54 = vadd.f32 1.0, %v5546_v53  ;;  %v5548_v36 = vpop.eup %5547 }
 0x54e   :  { %v1756_v28 = vadd.f32 1.0, %v5548_v36 }
 0x54f   :  { %5549 = vrcp.f32 %v1749_v54 }
 0x550   :  { %5551 = vrcp.f32 %v1756_v28 }
 0x559   :  { %v5550_v51 = vpop.eup %5549 }
 0x55a   :  { %v1759_v63 = vmul.f32 %v5550_v51, %v1742_v48  ;;  %v5552_v55 = vpop.eup %5551 }
 0x55b   :  { %v1762_v56 = vsub.f32 1.0, %v5552_v55  ;;  %v1764_v60 = vmul.f32 %v5552_v55, %v1510_v24 }
 0x55c   :  { %v1760_v49 = vadd.f32 %v1759_v63, %v6087_v14 }
 0x55e   :  { %5553 = vtanh.f32 %v1760_v49 }
 0x568   :  { %v5554_v57 = vpop.eup %5553 }
 0x569   :  { %v1763_v2 = vmul.f32 %v5554_v57, %v1762_v56 }
 0x56b   :  { %v1765_v0 = vadd.f32 %v1764_v60, %v1763_v2 }
 0x56d   :  { %1767 = vst.msk [vmem:[#allocation2 + $0x20] sm:$0xff] %vm494_vm2, %v1765_v0  ;;  %4993 = vmatmul.mubr.msk.f32.vlgmr.msra.gmra.mrb[32].mxu1 %vm494_vm2, %v1765_v0  ;;  %5004 = vmatmul.mubr.msk.f32.vlgmr.msra.gmra.mrb[22].mxu0 %vm494_vm2, %v1765_v0 }
 0x56e   :  { %5351 = vmatpush3.bf16.msra.mxu1 %v5923_v17  ;;  %5014 = vmatprep.mubr.msk.f32.mxu1 %vm5763_vm1, %v5764_v32 }
 0x56f   :  { %5352 = vmatprep.subr.bf16.mxu1 %v5762_v16  ;;  %5357 = vmatpush3.bf16.msra.mxu0 %v5960_v26 }
 0x570   :  { %5358 = vmatprep.subr.bf16.mxu0 %v5762_v16  ;;  %5025 = vmatprep.mubr.msk.f32.mxu0 %vm5763_vm1, %v5764_v32 }
 0x572   :  { %5354 = vmatpush3.bf16.msra.mxu1 %v5947_v23 }
 0x573   :  { %5361 = vmatprep.subr.bf16.mxu1 %v5762_v16  ;;  %5360 = vmatpush3.bf16.msra.mxu0 %v5975_v29 }
 0x574   :  { %5367 = vmatprep.subr.bf16.mxu0 %v5762_v16 }
 0x575   :  { %5015 = vmatmul.mubr.msk.f32.vlgmr.msra.gmra.mrb[34].mxu1 %vm494_vm2, %v1765_v0 }
 0x576   :  { %5363 = vmatpush3.bf16.msra.mxu1 %v5993_v34  ;;  %5036 = vmatprep.mubr.msk.f32.mxu1 %vm5763_vm1, %v5764_v32 }
 0x577   :  { %5364 = vmatprep.subr.bf16.mxu1 %v5762_v16 }
 0x57a   :  { %5366 = vmatpush3.bf16.msra.mxu1 %v6007_v37 }
 0x57b   :  { %5373 = vmatprep.subr.bf16.mxu1 %v5762_v16 }
 0x640   :  { %v1841_v26 = vpop.f32.mrb[32].mxu1  ;;  %v1915_v14 = vpop.f32.mrb[22].mxu0 }
 0x641   :  { %v2000_v1 = vadd.f32 %v1841_v26, %v6060_v59  ;;  %v2007_v29 = vadd.f32 %v1915_v14, %v6101_v46  ;;  %v4994_v3 = vpop.f32.mrb[33].mxu1  ;;  %v5005_v5 = vpop.f32.mrb[23].mxu0  ;;  %v2536_v26 = vld [vmem:[%s6629_s1 + $0x10] sm:$0xff]  ;;  %v2537_v14 = vld [vmem:[%s6629_s1 + $0x18] sm:$0x3] }
 0x643   :  { %v4460_v38 = vmul.f32 -1.442695, %v2000_v1  ;;  %v4461_v42 = vmul.f32 -1.442695, %v2007_v29  ;;  %v6319_v1 = vpack.c.bf16 %v2537_v14, %v2536_v26  ;;  %v5502_v26 = vld [vmem:[#allocation2 + $0xc] ss:$16 sps:$4 sm:$0xff]  }
 0x645   :  { %5555 = vpow2.f32 %v4460_v38 }
 0x646   :  { %5557 = vpow2.f32 %v4461_v42 }
 0x648   :  { %v1996_v43 = vpop.f32.mrb[34].mxu1 }
 0x649   :  { %v5016_v18 = vpop.f32.mrb[35].mxu1  ;;  %v1997_v19 = vadd.f32 %v6113_v40, %v1996_v43 }
 0x64f   :  { %v5556_v7 = vpop.eup %5555 }
 0x650   :  { %v2004_v10 = vadd.f32 1.0, %v5556_v7  ;;  %v5558_v12 = vpop.eup %5557 }
 0x651   :  { %v2011_v15 = vadd.f32 1.0, %v5558_v12 }
 0x652   :  { %5559 = vrcp.f32 %v2004_v10 }
 0x653   :  { %5561 = vrcp.f32 %v2011_v15 }
 0x65c   :  { %v5560_v21 = vpop.eup %5559 }
 0x65d   :  { %v2014_v59 = vmul.f32 %v5560_v21, %v1997_v19  ;;  %v5562_v50 = vpop.eup %5561 }
 0x65e   :  { %v2017_v30 = vsub.f32 1.0, %v5562_v50  ;;  %v2019_v4 = vmul.f32 %v5562_v50, %v1765_v0 }
 0x65f   :  { %v2015_v46 = vadd.f32 %v2014_v59, %v6081_v9  ;;  %v2278_v9 = vld [vmem:[%s6632_s4] sm:$0xff] }
 0x660   :  { %v5374_v24 = vpack.c.bf16 %v2279_v8, %v2278_v9  ;;  %v2563_v9 = vlaneseq }
 0x661   :  { %5563 = vtanh.f32 %v2015_v46 }
 0x66b   :  { %v5564_v52 = vpop.eup %5563 }
 0x66c   :  { %v2018_v22 = vmul.f32 %v5564_v52, %v2017_v30 }
 0x66e   :  { %v2020_v13 = vadd.f32 %v2019_v4, %v2018_v22  ;;  %v5765_v4 = vmov 1983009808  }
 0x670   :  { %2022 = vst.msk [vmem:[#allocation2 + $0x28] sm:$0xff] %vm494_vm2, %v2020_v13  ;;  %5026 = vmatmul.mubr.msk.f32.vlgmr.msra.gmra.mrb[24].mxu0 %vm494_vm2, %v2020_v13  ;;  %5037 = vmatmul.mubr.msk.f32.vlgmr.msra.gmra.mrb[36].mxu1 %vm494_vm2, %v2020_v13 }
 0x671   :  { %5369 = vmatpush3.bf16.msra.mxu0 %v5923_v17  ;;  %5047 = vmatprep.mubr.msk.f32.mxu0 %vm5763_vm1, %v5764_v32 }
 0x672   :  { %5370 = vmatprep.subr.bf16.mxu0 %v5762_v16  ;;  %5058 = vmatprep.mubr.msk.f32.mxu1 %vm5763_vm1, %v5764_v32 }
 0x673   :  { %5375 = vmatpush3.bf16.msra.mxu1 %v5374_v24 }
 0x674   :  { %5376 = vmatprep.subr.bf16.mxu1 %v5762_v16 }
 0x675   :  { %5372 = vmatpush3.bf16.msra.mxu0 %v5947_v23 }
 0x676   :  { %5379 = vmatprep.subr.bf16.mxu0 %v5762_v16 }
 0x678   :  { %5048 = vmatmul.mubr.msk.f32.vlgmr.msra.gmra.mrb[26].mxu0 %vm494_vm2, %v2020_v13 }
 0x679   :  { %5381 = vmatpush3.bf16.msra.mxu0 %v5993_v34  ;;  %5069 = vmatprep.mubr.msk.f32.mxu0 %vm5763_vm1, %v5764_v32  ;;  %v2280_v34 = vld [vmem:[%s6632_s4 + $0x10] sm:$0xff] }
 0x67a   :  { %5382 = vmatprep.subr.bf16.mxu0 %v5762_v16 }
 0x67d   :  { %5384 = vmatpush3.bf16.msra.mxu0 %v6007_v37  ;;  %v5377_v37 = vpack.c.bf16 %v2281_v61, %v2280_v34 }
 0x67e   :  { %5391 = vmatprep.subr.bf16.mxu0 %v5762_v16 }
 0x67f   :  { %5378 = vmatpush3.bf16.msra.mxu1 %v5377_v37  ;;  %v2564_v37 = vshrl.u32 %v2563_v9, 7 }
 0x680   :  { %5385 = vmatprep.subr.bf16.mxu1 %v5762_v16 }
 0x743   :  { %v2096_v27 = vpop.f32.mrb[24].mxu0  ;;  %v2170_v31 = vpop.f32.mrb[36].mxu1 }
 0x744   :  { %v2255_v35 = vadd.f32 %v2096_v27, %v6084_v11  ;;  %v2262_v39 = vadd.f32 %v2170_v31, %v6108_v62  ;;  %v5027_v41 = vpop.f32.mrb[25].mxu0  ;;  %v5038_v44 = vpop.f32.mrb[37].mxu1  ;;  %v5766_v27 = vmov 1934713408  }
 0x745   :  { %v2625_v31 = vunpack.c.l.s4 %v5766_v27 }
 0x746   :  { %v4475_v45 = vmul.f32 -1.442695, %v2255_v35  ;;  %v4476_v33 = vmul.f32 -1.442695, %v2262_v39 }
 0x747   :  { %v2626_v44 = vunpack.c.0.s8 %v2625_v31 }
 0x748   :  { %5565 = vpow2.f32 %v4475_v45 }
 0x749   :  { %5567 = vpow2.f32 %v4476_v33 }
 0x74b   :  { %v2251_v47 = vpop.f32.mrb[26].mxu0 }
 0x74c   :  { %v5049_v53 = vpop.f32.mrb[27].mxu0  ;;  %v2252_v51 = vadd.f32 %v6113_v40, %v2251_v47 }
 0x752   :  { %v5566_v54 = vpop.eup %5565 }
 0x753   :  { %v2259_v36 = vadd.f32 1.0, %v5566_v54  ;;  %v5568_v28 = vpop.eup %5567 }
 0x754   :  { %v2266_v48 = vadd.f32 1.0, %v5568_v28  ;;  %v2538_v28 = vld [vmem:[%s6629_s1 + $0x20] sm:$0xff] }
 0x755   :  { %5569 = vrcp.f32 %v2259_v36  ;;  %v6335_v36 = vsub.s32 %v2626_v44, %v2564_v37 }
 0x756   :  { %5571 = vrcp.f32 %v2266_v48 }
 0x75f   :  { %v5570_v63 = vpop.eup %5569 }
 0x760   :  { %v2269_v11 = vmul.f32 %v5570_v63, %v2252_v51  ;;  %v5572_v49 = vpop.eup %5571  ;;  %v2539_v51 = vld [vmem:[%s6629_s1 + $0x28] sm:$0x3]  ;;  %v2540_v63 = vld [vmem:[%s6629_s1 + $0x30] sm:$0xff] }
 0x761   :  { %v2272_v55 = vsub.f32 1.0, %v5572_v49  ;;  %v2274_v2 = vmul.f32 %v5572_v49, %v2020_v13  ;;  %v2561_v13 = vunpack.c.l.s4 %v5765_v4  ;;  %v2549_v4 = vld [vmem:[%s6629_s1 + $0x78] sm:$0x3] }
 0x762   :  { %v2270_v62 = vadd.f32 %v2269_v11, %v6095_v25  ;;  %v2535_v25 = vld [vmem:[%s6629_s1 + $0x8] sm:$0x3]  ;;  %v2541_v11 = vld [vmem:[%s6629_s1 + $0x38] sm:$0x3] }
 0x763   :  { %v2562_v61 = vunpack.c.0.s8 %v2561_v13 }
 0x764   :  { %5573 = vtanh.f32 %v2270_v62 }
 0x765   :  { %v2565_v35 = vsub.s32 %v2562_v61, %v2564_v37 }
 0x76e   :  { %v5574_v56 = vpop.eup %5573 }
 0x76f   :  { %v2273_v57 = vmul.f32 %v5574_v56, %v2272_v55  ;;  %v6351_v55 = vpack.c.bf16 %v2539_v51, %v2538_v28  ;;  %v6353_v56 = vpack.c.bf16 %v2541_v11, %v2540_v63 }
 0x771   :  { %v2275_v60 = vadd.f32 %v2274_v2, %v2273_v57 }
 0x773   :  { %2277 = vst.msk [vmem:[#allocation2 + $0x30] sm:$0xff] %vm494_vm2, %v2275_v60  ;;  %5059 = vmatmul.mubr.msk.f32.vlgmr.msra.gmra.mrb[38].mxu1 %vm494_vm2, %v2275_v60  ;;  %5070 = vmatmul.mubr.msk.f32.vlgmr.msra.gmra.mrb[28].mxu0 %vm494_vm2, %v2275_v60 }
 0x774   :  { %5387 = vmatpush3.bf16.msra.mxu1 %v5923_v17  ;;  %5080 = vmatprep.mubr.msk.f32.mxu1 %vm5763_vm1, %v5764_v32  ;;  %v2534_v17 = vld [vmem:[%s6629_s1] sm:$0xff] }
 0x775   :  { %5388 = vmatprep.subr.bf16.mxu1 %v5762_v16  ;;  %5087 = vmatprep.mubr.msk.f32.mxu0 %vm5763_vm1, %v5764_v32 }
 0x778   :  { %5390 = vmatpush3.bf16.msra.mxu1 %v5947_v23  ;;  %v6311_v23 = vpack.c.bf16 %v2535_v25, %v2534_v17 }
 0x779   :  { %5395 = vmatprep.subr.bf16.mxu1 %v5762_v16 }
 0x77a   :  { %5394 = vmatpush3.bf16.xpose.msk.msra.mxu0 %vm6307_vm3, %v6311_v23  ;;  %v5497_v41 = vld [vmem:[#allocation2 + $0x20] ss:$16 sps:$4 sm:$0xff]   ;;  %v5503_v14 = vld [vmem:[#allocation2 + $0x24] ss:$16 sps:$4 sm:$0xff]  }
 0x77b   :  { %5081 = vmatmul.mubr.msk.f32.vlgmr.msra.gmra.mrb[40].mxu1 %vm494_vm2, %v2275_v60  ;;  %5399 = vmatprep.subr.bf16.mxu0 %v5762_v16  ;;  %v2598_v47 = vrot.slane %v5497_v41, %v2565_v35 }
 0x77c   :  { %5094 = vmatprep.mubr.msk.f32.mxu1 %vm5763_vm1, %v5764_v32 }
 0x781   :  { %5398 = vmatpush3.bf16.xpose.msk.msra.mxu1 %vm6307_vm3, %v6319_v1 }
 0x782   :  { %5403 = vmatprep.subr.bf16.mxu1 %v5762_v16 }
 0x846   :  { %v2351_v29 = vpop.f32.mrb[38].mxu1  ;;  %v2425_v3 = vpop.f32.mrb[28].mxu0 }
 0x847   :  { %v2510_v5 = vadd.f32 %v2351_v29, %v6075_v6  ;;  %v2517_v38 = vadd.f32 %v2425_v3, %v6106_v58  ;;  %v5060_v42 = vpop.f32.mrb[39].mxu1  ;;  %v5071_v43 = vpop.f32.mrb[29].mxu0  ;;  %v2542_v29 = vld [vmem:[%s6629_s1 + $0x40] sm:$0xff] }
 0x848   :  { %v5501_v3 = vld [vmem:[#allocation2 + $0x4] ss:$16 sps:$4 sm:$0xff]   ;;  %v2545_v43 = vld [vmem:[%s6629_s1 + $0x58] sm:$0x3] }
 0x849   :  { %v4490_v18 = vmul.f32 -1.442695, %v2510_v5  ;;  %v4491_v7 = vmul.f32 -1.442695, %v2517_v38  ;;  %v2543_v38 = vld [vmem:[%s6629_s1 + $0x48] sm:$0x3] }
 0x84a   :  { %v2544_v42 = vld [vmem:[%s6629_s1 + $0x50] sm:$0xff] }
 0x84b   :  { %5575 = vpow2.f32 %v4490_v18 }
 0x84c   :  { %5577 = vpow2.f32 %v4491_v7 }
 0x84e   :  { %v2506_v10 = vpop.f32.mrb[40].mxu1 }
 0x84f   :  { %v5082_v12 = vpop.f32.mrb[41].mxu1  ;;  %v2507_v46 = vadd.f32 %v6113_v40, %v2506_v10  ;;  %v5495_v40 = vld [vmem:[#allocation2 + $0x8] ss:$16 sps:$4 sm:$0xff]   ;;  %v2589_v10 = vrot.slane %v5502_v26, %v2565_v35 }
 0x850   :  { %v2582_v39 = vrot.slane %v5495_v40, %v2565_v35  ;;  %v2605_v12 = vrot.slane %v5503_v14, %v2565_v35 }
 0x855   :  { %v5576_v15 = vpop.eup %5575 }
 0x856   :  { %v2514_v19 = vadd.f32 1.0, %v5576_v15  ;;  %v5578_v21 = vpop.eup %5577  ;;  %v6389_v15 = vpack.c.bf16 %v2543_v38, %v2542_v29 }
 0x857   :  { %v2521_v59 = vadd.f32 1.0, %v5578_v21 }
 0x858   :  { %5579 = vrcp.f32 %v2514_v19  ;;  %v6391_v19 = vpack.c.bf16 %v2545_v43, %v2544_v42 }
 0x859   :  { %5581 = vrcp.f32 %v2521_v59 }
 0x862   :  { %v5580_v50 = vpop.eup %5579 }
 0x863   :  { %v2524_v6 = vmul.f32 %v5580_v50, %v2507_v46  ;;  %v5582_v30 = vpop.eup %5581  ;;  %v2573_v46 = vrot.slane %v5501_v3, %v2565_v35 }
 0x864   :  { %v2527_v52 = vsub.f32 1.0, %v5582_v30  ;;  %v2529_v8 = vmul.f32 %v5582_v30, %v2275_v60 }
 0x865   :  { %v2525_v58 = vadd.f32 %v2524_v6, %v6092_v20  ;;  %v5493_v20 = vld [vmem:[#allocation2] ss:$16 sps:$4 sm:$0xff]   ;;  %v2638_v6 = vcombine.low %v2573_v46, %v2589_v10  ;;  %v2639_v37 = vcombine.high %v2573_v46, %v2589_v10 }
 0x866   :  { %v2566_v45 = vrot.slane %v5493_v20, %v2565_v35 }
 0x867   :  { %5583 = vtanh.f32 %v2525_v58  ;;  %v2546_v58 = vld [vmem:[%s6629_s1 + $0x60] sm:$0xff]  ;;  %v2646_v13 = vrot.slane %v2638_v6, %v6335_v36  ;;  %v2653_v27 = vrot.slane %v2639_v37, %v6335_v36 }
 0x868   :  { %v2622_v54 = vcombine.low %v2566_v45, %v2582_v39  ;;  %v2623_v25 = vcombine.high %v2566_v45, %v2582_v39 }
 0x86a   :  { %v2630_v62 = vrot.slane %v2622_v54, %v6335_v36  ;;  %v2637_v7 = vrot.slane %v2623_v25, %v6335_v36 }
 0x871   :  { %v5584_v22 = vpop.eup %5583 }
 0x872   :  { %v2528_v34 = vmul.f32 %v5584_v22, %v2527_v52  ;;  %v2547_v52 = vld [vmem:[%s6629_s1 + $0x68] sm:$0x3]  ;;  %v2548_v22 = vld [vmem:[%s6629_s1 + $0x70] sm:$0xff]  ;;  %s5768_s1 = smov [#allocation10]  }
 0x873   :  { %v6427_v9 = vpack.c.bf16 %v2547_v52, %v2546_v58  ;;  %s4307_s23 = sshll.u32 %s5768_s1, 4  ;;  %s4308_s23 = int_to_ptr.vmem [resolvable:$true] %s4307_s23 }
 0x874   :  { %v2530_v24 = vadd.f32 %v2529_v8, %v2528_v34  ;;  %v6429_v8 = vpack.c.bf16 %v2549_v4, %v2548_v22  ;;  %s5683_s24 = scalar_lea.vmem %s4308_s23, 128  ;;  %p5688_p11 = scmp.lt.s32.totalorder %s4308_s23, %s4308_s23 }
 0x875   :  { %p5684_p10 = scmp.ne.s32.totalorder %s4308_s23, %s5683_s24  ;;  %p5689_p12 = scmp.lt.s32.totalorder %s5683_s24, %s5683_s24 }
 0x876   :  { %2532 = vst.msk [vmem:[#allocation2 + $0x38] sm:$0xff] %vm494_vm2, %v2530_v24  ;;  %2533 = vst.msk [vmem:[#allocation10] sm:$0xff] %vm494_vm2, %v2530_v24 }
 0x877   :  { %p5690_p13 = por %p5689_p12, %p5688_p11 }
 0x879   :  { %p5691_p0 = pnand %p5690_p13, %p5684_p10 }
 0x87d   :  { %v5499_v33 = vld [vmem:[#allocation2 + $0x28] ss:$16 sps:$4 sm:$0xff]   ;;  %v5504_v17 = vld [vmem:[#allocation2 + $0x2c] ss:$16 sps:$4 sm:$0xff]  }
 0x87e   :  { %v2614_v53 = vrot.slane %v5499_v33, %v2565_v35  ;;  %v2621_v18 = vrot.slane %v5504_v17, %v2565_v35 }
 0x880   :  { %v2654_v48 = vcombine.low %v2598_v47, %v2614_v53  ;;  %v2655_v60 = vcombine.high %v2598_v47, %v2614_v53  ;;  %v2670_v50 = vcombine.low %v2605_v12, %v2621_v18  ;;  %v2671_v61 = vcombine.high %v2605_v12, %v2621_v18 }
 0x882   :  { %v2662_v49 = vrot.slane %v2654_v48, %v6335_v36  ;;  %v2669_v5 = vrot.slane %v2655_v60, %v6335_v36  ;;  %v2678_v30 = vrot.slane %v2670_v50, %v6335_v36  ;;  %v2685_v40 = vrot.slane %v2671_v61, %v6335_v36 }
 0x884   :  { %v6355_v57 = vcombine.low %v2630_v62, %v2662_v49  ;;  %v6357_v2 = vcombine.high %v2630_v62, %v2662_v49  ;;  %v6393_v21 = vcombine.low %v2637_v7, %v2669_v5  ;;  %v6395_v59 = vcombine.high %v2637_v7, %v2669_v5 }
 0x885   :  { %v6431_v34 = vcombine.low %v2646_v13, %v2678_v30  ;;  %v6433_v24 = vcombine.high %v2646_v13, %v2678_v30  ;;  %v6453_v31 = vcombine.low %v2653_v27, %v2685_v40  ;;  %v6455_v20 = vcombine.high %v2653_v27, %v2685_v40 }
 0x886   :  { %5088 = vmatmul.mubr.msk.f32.vlgmr.msra.gmra.mrb[30].mxu0 %vm494_vm2, %v6355_v57  ;;  %5095 = vmatmul.mubr.msk.f32.vlgmr.msra.gmra.mrb[42].mxu1 %vm494_vm2, %v6357_v2 }
 0x887   :  { %5402 = vmatpush3.bf16.xpose.msk.msra.mxu0 %vm6307_vm3, %v6351_v55  ;;  %5406 = vmatpush3.bf16.xpose.msk.msra.mxu1 %vm6307_vm3, %v6353_v56 }
 0x888   :  { %5101 = vmatprep.mubr.msk.f32.mxu0 %vm5763_vm1, %v5764_v32  ;;  %5108 = vmatprep.mubr.msk.f32.mxu1 %vm5763_vm1, %v5764_v32 }
 0x889   :  { %5407 = vmatprep.subr.bf16.mxu0 %v5762_v16  ;;  %5411 = vmatprep.subr.bf16.mxu1 %v5762_v16 }
 0x88e   :  { %5102 = vmatmul.mubr.msk.f32.vlgmr.msra.gmra.mrb[32].mxu0 %vm494_vm2, %v6393_v21  ;;  %5109 = vmatmul.mubr.msk.f32.vlgmr.msra.gmra.mrb[44].mxu1 %vm494_vm2, %v6395_v59 }
 0x88f   :  { %5410 = vmatpush3.bf16.xpose.msk.msra.mxu0 %vm6307_vm3, %v6389_v15  ;;  %5414 = vmatpush3.bf16.xpose.msk.msra.mxu1 %vm6307_vm3, %v6391_v19 }
 0x890   :  { %5115 = vmatprep.mubr.msk.f32.mxu0 %vm5763_vm1, %v5764_v32  ;;  %5122 = vmatprep.mubr.msk.f32.mxu1 %vm5763_vm1, %v5764_v32 }
 0x891   :  { %5415 = vmatprep.subr.bf16.mxu0 %v5762_v16  ;;  %5419 = vmatprep.subr.bf16.mxu1 %v5762_v16 }
 0x896   :  { %5116 = vmatmul.mubr.msk.f32.vlgmr.msra.gmra.mrb[34].mxu0 %vm494_vm2, %v6431_v34  ;;  %5123 = vmatmul.mubr.msk.f32.vlgmr.msra.gmra.mrb[46].mxu1 %vm494_vm2, %v6433_v24 }
 0x897   :  { %5418 = vmatpush3.bf16.xpose.msk.msra.mxu0 %vm6307_vm3, %v6427_v9  ;;  %5422 = vmatpush3.bf16.xpose.msk.msra.mxu1 %vm6307_vm3, %v6429_v8 }
 0x898   :  { %5129 = vmatprep.mubr.msk.f32.mxu0 %vm5763_vm1, %v5764_v32  ;;  %5136 = vmatprep.mubr.msk.f32.mxu1 %vm5763_vm1, %v5764_v32 }
 0x899   :  { %5423 = vmatprep.subr.bf16.mxu0 %v5762_v16  ;;  %5427 = vmatprep.subr.bf16.mxu1 %v5762_v16 }
 0x89e   :  { %5130 = vmatmul.mubr.msk.f32.vlgmr.msra.gmra.mrb[36].mxu0 %vm494_vm2, %v6453_v31  ;;  %5137 = vmatmul.mubr.msk.f32.vlgmr.msra.gmra.mrb[48].mxu1 %vm494_vm2, %v6455_v20 }
 0x89f   :  { %5143 = vmatprep.mubr.msk.f32.mxu0 %vm5763_vm1, %v5764_v32  ;;  %5150 = vmatprep.mubr.msk.f32.mxu1 %vm5763_vm1, %v5764_v32 }
 0x8a0   :  { %5426 = vmatpush3.bf16.msk.msra.mxu0 %vm6493_vm7, %v6311_v23  ;;  %5430 = vmatpush3.bf16.msk.msra.mxu1 %vm6493_vm7, %v6319_v1 }
 0x8a1   :  { %5431 = vmatprep.subr.bf16.mxu0 %v5762_v16  ;;  %5435 = vmatprep.subr.bf16.mxu1 %v5762_v16 }
 0x959   :  { %v2769_v0 = vpop.f32.mrb[30].mxu0  ;;  %v2848_v35 = vpop.f32.mrb[42].mxu1 }
 0x95a   :  { %v5089_v39 = vpop.f32.mrb[31].mxu0  ;;  %v5096_v41 = vpop.f32.mrb[43].mxu1  ;;  %v3327_v44 = vsel %vm3326_vm4, %v2769_v0, -inf  ;;  %v3330_v45 = vsel %vm3326_vm4, %v2848_v35, -inf }
 0x95b   :  { %3328 = vmax.xlane.f32.xlu0 %v3327_v44 }
 0x95f   :  { %3331 = vmax.xlane.f32.xlu0 %v3330_v45 }
 0x961   :  { %v2927_v33 = vpop.f32.mrb[32].mxu0  ;;  %v3006_v47 = vpop.f32.mrb[44].mxu1 }
 0x962   :  { %v5103_v53 = vpop.f32.mrb[33].mxu0  ;;  %v5110_v54 = vpop.f32.mrb[45].mxu1  ;;  %v3333_v36 = vsel %vm3326_vm4, %v2927_v33, -inf  ;;  %v3336_v28 = vsel %vm3326_vm4, %v3006_v47, -inf }
 0x963   :  { %3334 = vmax.xlane.f32.xlu1 %v3333_v36 }
 0x967   :  { %3337 = vmax.xlane.f32.xlu1 %v3336_v28 }
 0x969   :  { %v3085_v48 = vpop.f32.mrb[34].mxu0  ;;  %v3164_v51 = vpop.f32.mrb[46].mxu1 }
 0x96a   :  { %v5117_v63 = vpop.f32.mrb[35].mxu0  ;;  %v5124_v11 = vpop.f32.mrb[47].mxu1  ;;  %v3342_v62 = vsel %vm3326_vm4, %v3164_v51, -inf  ;;  %v3339_v49 = vsel %vm3326_vm4, %v3085_v48, -inf }
 0x96b   :  { %3343 = vmax.xlane.f32.xlu1 %v3342_v62  ;;  %3340 = vmax.xlane.f32.xlu0 %v3339_v49 }
 0x971   :  { %v3243_v60 = vpop.f32.mrb[36].mxu0  ;;  %v3322_v17 = vpop.f32.mrb[48].mxu1 }
 0x972   :  { %v5131_v25 = vpop.f32.mrb[37].mxu0  ;;  %v5138_v26 = vpop.f32.mrb[49].mxu1  ;;  %v3348_v14 = vsel %vm3326_vm4, %v3322_v17, -inf  ;;  %v3345_v29 = vsel %vm3326_vm4, %v3243_v60, -inf }
 0x973   :  { %3349 = vmax.xlane.f32.xlu1 %v3348_v14  ;;  %3346 = vmax.xlane.f32.xlu0 %v3345_v29 }
 0x9e8   :  { %v3329_v3 = vpop.xlane.xlu0 %3328 }
 0x9e9   :  { %v3351_v5 = vsub.f32 %v2769_v0, %v3329_v3 }
 0x9eb   :  { %v3359_v38 = vmul.f32 1.442695, %v3351_v5 }
 0x9ec   :  { %v3332_v42 = vpop.xlane.xlu0 %3331 }
 0x9ed   :  { %5585 = vpow2.f32 %v3359_v38  ;;  %v3352_v43 = vsub.f32 %v2848_v35, %v3332_v42 }
 0x9ef   :  { %v3361_v18 = vmul.f32 1.442695, %v3352_v43 }
 0x9f0   :  { %v3335_v7 = vpop.xlane.xlu1 %3334 }
 0x9f1   :  { %5587 = vpow2.f32 %v3361_v18  ;;  %v3353_v10 = vsub.f32 %v2927_v33, %v3335_v7 }
 0x9f3   :  { %v3363_v12 = vmul.f32 1.442695, %v3353_v10  ;;  %v4028_v10 = vld [vmem:[#allocation8] sm:$0xff] }
 0x9f4   :  { %v3338_v46 = vpop.xlane.xlu1 %3337 }
 0x9f5   :  { %5589 = vpow2.f32 %v3363_v12  ;;  %v3354_v50 = vsub.f32 %v3006_v47, %v3338_v46  ;;  %v4029_v12 = vld [vmem:[#allocation8 + $0x8] sm:$0xff] }
 0x9f7   :  { %v5586_v6 = vpop.eup %5585  ;;  %v3365_v58 = vmul.f32 1.442695, %v3354_v50 }
 0x9f8   :  { %v3344_v30 = vpop.xlane.xlu1 %3343  ;;  %v3341_v52 = vpop.xlane.xlu0 %3340  ;;  %v3375_v22 = vsel %vm3326_vm4, %v5586_v6, 0.0 }
 0x9f9   :  { %5591 = vpow2.f32 %v3365_v58  ;;  %v3356_v4 = vsub.f32 %v3164_v51, %v3344_v30  ;;  %v3355_v13 = vsub.f32 %v3085_v48, %v3341_v52  ;;  %3376 = vadd.xlane.f32.xlu0 %v3375_v22  ;;  %v5455_v58 = vpack.c.bf16 %v4029_v12, %v4028_v10 }
 0x9fb   :  { %v5588_v61 = vpop.eup %5587  ;;  %v3369_v37 = vmul.f32 1.442695, %v3356_v4  ;;  %v3367_v40 = vmul.f32 1.442695, %v3355_v13  ;;  %v4025_v4 = vld [vmem:[#allocation6 + $0x8] sm:$0xff] }
 0x9fc   :  { %v3378_v27 = vsel %vm3326_vm4, %v5588_v61, 0.0 }
 0x9fd   :  { %5593 = vpow2.f32 %v3369_v37  ;;  %3379 = vadd.xlane.f32.xlu1 %v3378_v27  ;;  %v4026_v37 = vld [vmem:[#allocation6 + $0x10] sm:$0xff] }
 0x9fe   :  { %5595 = vpow2.f32 %v3367_v40  ;;  %v4027_v40 = vld [vmem:[#allocation6 + $0x18] sm:$0xff] }
 0x9ff   :  { %v5590_v0 = vpop.eup %5589 }
 0xa00   :  { %v3350_v35 = vpop.xlane.xlu1 %3349  ;;  %v3347_v39 = vpop.xlane.xlu0 %3346  ;;  %v3381_v41 = vsel %vm3326_vm4, %v5590_v0, 0.0 }
 0xa01   :  { %v3358_v44 = vsub.f32 %v3322_v17, %v3350_v35  ;;  %v3357_v45 = vsub.f32 %v3243_v60, %v3347_v39  ;;  %3382 = vadd.xlane.f32.xlu0 %v3381_v41 }
 0xa03   :  { %v5592_v33 = vpop.eup %5591  ;;  %v3373_v47 = vmul.f32 1.442695, %v3358_v44  ;;  %v3371_v53 = vmul.f32 1.442695, %v3357_v45 }
 0xa04   :  { %v3384_v54 = vsel %vm3326_vm4, %v5592_v33, 0.0 }
 0xa05   :  { %5597 = vpow2.f32 %v3373_v47  ;;  %3385 = vadd.xlane.f32.xlu1 %v3384_v54 }
 0xa06   :  { %5599 = vpow2.f32 %v3371_v53 }
 0xa07   :  { %v6477_v36 = vpop.eup %5593 }
 0xa08   :  { %v6479_v28 = vpop.eup %5595  ;;  %v3390_v48 = vsel %vm3326_vm4, %v6477_v36, 0.0 }
 0xa09   :  { %3391 = vadd.xlane.f32.xlu1 %v3390_v48  ;;  %v3387_v51 = vsel %vm3326_vm4, %v6479_v28, 0.0 }
 0xa0a   :  { %3388 = vadd.xlane.f32.xlu0 %v3387_v51 }
 0xa0f   :  { %v6485_v63 = vpop.eup %5597 }
 0xa10   :  { %v6487_v11 = vpop.eup %5599  ;;  %v3396_v62 = vsel %vm3326_vm4, %v6485_v63, 0.0 }
 0xa11   :  { %3397 = vadd.xlane.f32.xlu1 %v3396_v62  ;;  %v3393_v49 = vsel %vm3326_vm4, %v6487_v11, 0.0 }
 0xa12   :  { %3394 = vadd.xlane.f32.xlu0 %v3393_v49 }
 0xa86   :  { %v3377_v17 = vpop.xlane.xlu0 %3376 }
 0xa87   :  { %5601 = vrcp.f32 %v3377_v17 }
 0xa8a   :  { %v3380_v25 = vpop.xlane.xlu1 %3379 }
 0xa8b   :  { %5603 = vrcp.f32 %v3380_v25 }
 0xa8e   :  { %v3383_v26 = vpop.xlane.xlu0 %3382 }
 0xa8f   :  { %5605 = vrcp.f32 %v3383_v26 }
 0xa91   :  { %v5602_v14 = vpop.eup %5601 }
 0xa92   :  { %v3407_v29 = vmul.f32 %v5602_v14, %v5586_v6  ;;  %v3386_v3 = vpop.xlane.xlu1 %3385 }
 0xa93   :  { %5607 = vrcp.f32 %v3386_v3 }
 0xa94   :  { %3415 = vst.msk [vmem:[#allocation12] sm:$0xff] %vm3326_vm4, %v3407_v29  ;;  %5144 = vmatmul.mubr.msk.f32.vlgmr.msra.gmra.mrb[38].mxu0 %vm3326_vm4, %v3407_v29 }
 0xa95   :  { %v5604_v23 = vpop.eup %5603  ;;  %5434 = vmatpush3.bf16.msk.msra.mxu0 %vm6493_vm7, %v6351_v55  ;;  %5157 = vmatprep.mubr.msk.f32.mxu0 %vm5763_vm1, %v5764_v32 }
 0xa96   :  { %v3408_v1 = vmul.f32 %v5604_v23, %v5588_v61  ;;  %v3392_v5 = vpop.xlane.xlu1 %3391  ;;  %5439 = vmatprep.subr.bf16.mxu0 %v5762_v16 }
 0xa97   :  { %5609 = vrcp.f32 %v3392_v5  ;;  %v3389_v38 = vpop.xlane.xlu0 %3388 }
 0xa98   :  { %3416 = vst.msk [vmem:[#allocation12 + $0x8] sm:$0xff] %vm3326_vm4, %v3408_v1  ;;  %5611 = vrcp.f32 %v3389_v38  ;;  %5151 = vmatmul.mubr.msk.f32.vlgmr.msra.gmra.mrb[50].mxu1 %vm3326_vm4, %v3408_v1 }
 0xa99   :  { %v5606_v42 = vpop.eup %5605  ;;  %5438 = vmatpush3.bf16.msk.msra.mxu1 %vm6493_vm7, %v6353_v56  ;;  %5164 = vmatprep.mubr.msk.f32.mxu1 %vm5763_vm1, %v5764_v32 }
 0xa9a   :  { %v3409_v55 = vmul.f32 %v5606_v42, %v5590_v0  ;;  %5443 = vmatprep.subr.bf16.mxu1 %v5762_v16  ;;  %v5467_v0 = vpack.c.bf16 %v4027_v40, %v4026_v37 }
 0xa9c   :  { %3417 = vst.msk [vmem:[#allocation12 + $0x10] sm:$0xff] %vm3326_vm4, %v3409_v55  ;;  %5158 = vmatmul.mubr.msk.f32.vlgmr.msra.gmra.mrb[40].mxu0 %vm3326_vm4, %v3409_v55 }
 0xa9d   :  { %v5608_v43 = vpop.eup %5607  ;;  %5442 = vmatpush3.bf16.msk.msra.mxu0 %vm6493_vm7, %v6389_v15  ;;  %5171 = vmatprep.mubr.msk.f32.mxu0 %vm5763_vm1, %v5764_v32 }
 0xa9e   :  { %v3410_v18 = vmul.f32 %v5608_v43, %v5592_v33  ;;  %v3398_v56 = vpop.xlane.xlu1 %3397  ;;  %5447 = vmatprep.subr.bf16.mxu0 %v5762_v16 }
 0xa9f   :  { %5613 = vrcp.f32 %v3398_v56  ;;  %v3395_v7 = vpop.xlane.xlu0 %3394 }
 0xaa0   :  { %3418 = vst.msk [vmem:[#allocation12 + $0x18] sm:$0xff] %vm3326_vm4, %v3410_v18  ;;  %5615 = vrcp.f32 %v3395_v7  ;;  %5165 = vmatmul.mubr.msk.f32.vlgmr.msra.gmra.mrb[52].mxu1 %vm3326_vm4, %v3410_v18 }
 0xaa1   :  { %v5610_v46 = vpop.eup %5609  ;;  %5446 = vmatpush3.bf16.msk.msra.mxu1 %vm6493_vm7, %v6391_v19  ;;  %5178 = vmatprep.mubr.msk.f32.mxu1 %vm5763_vm1, %v5764_v32 }
 0xaa2   :  { %v5612_v15 = vpop.eup %5611  ;;  %v3412_v50 = vmul.f32 %v5610_v46, %v6477_v36  ;;  %5451 = vmatprep.subr.bf16.mxu1 %v5762_v16 }
 0xaa3   :  { %v3411_v6 = vmul.f32 %v5612_v15, %v6479_v28 }
 0xaa4   :  { %3420 = vst.msk [vmem:[#allocation12 + $0x28] sm:$0xff] %vm3326_vm4, %v3412_v50  ;;  %5179 = vmatmul.mubr.msk.f32.vlgmr.msra.gmra.mrb[54].mxu1 %vm3326_vm4, %v3412_v50 }
 0xaa5   :  { %3419 = vst.msk [vmem:[#allocation12 + $0x20] sm:$0xff] %vm3326_vm4, %v3411_v6  ;;  %5172 = vmatmul.mubr.msk.f32.vlgmr.msra.gmra.mrb[42].mxu0 %vm3326_vm4, %v3411_v6  ;;  %5454 = vmatpush3.bf16.msk.msra.mxu1 %vm6493_vm7, %v6429_v8  ;;  %v4031_v8 = vld [vmem:[#allocation8 + $0x18] sm:$0xff] }
 0xaa6   :  { %5450 = vmatpush3.bf16.msk.msra.mxu0 %vm6493_vm7, %v6427_v9  ;;  %5185 = vmatprep.mubr.msk.f32.mxu0 %vm5763_vm1, %v5764_v32  ;;  %v4030_v9 = vld [vmem:[#allocation8 + $0x10] sm:$0xff] }
 0xaa7   :  { %5192 = vmatprep.mubr.msk.f32.mxu1 %vm5763_vm1, %v5764_v32  ;;  %5456 = vmatprep.subr.bf16.mxu0 %v5455_v58  ;;  %v5459_v22 = vpack.c.bf16 %v4031_v8, %v4030_v9  ;;  %v4024_v32 = vld [vmem:[#allocation6] sm:$0xff] }
 0xaa8   :  { %v5463_v13 = vpack.c.bf16 %v4025_v4, %v4024_v32 }
 0xaa9   :  { %v5614_v16 = vpop.eup %5613 }
 0xaaa   :  { %v5616_v19 = vpop.eup %5615  ;;  %v3414_v30 = vmul.f32 %v5614_v16, %v6485_v63 }
 0xaab   :  { %v3413_v52 = vmul.f32 %v5616_v19, %v6487_v11 }
 0xaac   :  { %3422 = vst.msk [vmem:[#allocation12 + $0x38] sm:$0xff] %vm3326_vm4, %v3414_v30  ;;  %5193 = vmatmul.mubr.msk.f32.vlgmr.msra.gmra.mrb[56].mxu1 %vm3326_vm4, %v3414_v30 }
 0xaad   :  { %3421 = vst.msk [vmem:[#allocation12 + $0x30] sm:$0xff] %vm3326_vm4, %v3413_v52  ;;  %5186 = vmatmul.mubr.msk.f32.vlgmr.msra.gmra.mrb[44].mxu0 %vm3326_vm4, %v3413_v52 }
 0xaae   :  { %5458 = vmatpush3.bf16.msra.mxu0 %v5455_v58 }
 0xaaf   :  { %5460 = vmatprep.subr.bf16.mxu0 %v5459_v22 }
 0xab2   :  { %5462 = vmatpush3.bf16.msra.mxu0 %v5459_v22 }
 0xab3   :  { %5464 = vmatprep.subr.bf16.mxu0 %v5463_v13 }
 0xb67   :  { %v3495_v61 = vpop.f32.mrb[38].mxu0 }
 0xb68   :  { %v5145_v27 = vpop.f32.mrb[39].mxu0  ;;  %5203 = vmatprep.mubr.msk.f32.mxu0 %vm494_vm2, %v3495_v61 }
 0xb6b   :  { %v3570_v35 = vpop.f32.mrb[50].mxu1 }
 0xb6c   :  { %v5152_v39 = vpop.f32.mrb[51].mxu1  ;;  %5204 = vmatmul.mubr.msk.f32.vlgmr.msra.gmra.mrb[46].mxu0 %vm494_vm2, %v3570_v35 }
 0xb6d   :  { %5466 = vmatpush3.bf16.msra.mxu0 %v5463_v13 }
 0xb6e   :  { %5468 = vmatprep.subr.bf16.mxu0 %v5467_v0 }
 0xb6f   :  { %v3645_v41 = vpop.f32.mrb[40].mxu0 }
 0xb70   :  { %v5159_v44 = vpop.f32.mrb[41].mxu0  ;;  %5206 = vmatprep.mubr.msk.f32.mxu0 %vm494_vm2, %v3645_v41 }
 0xb71   :  { %5470 = vmatpush3.bf16.msra.mxu0 %v5467_v0 }
 0xb73   :  { %v3720_v45 = vpop.f32.mrb[52].mxu1 }
 0xb74   :  { %v5166_v33 = vpop.f32.mrb[53].mxu1  ;;  %5207 = vmatmul.mubr.msk.f32.gmra.mrb[48].mxu0 %vm494_vm2, %v3720_v45 }
 0xb77   :  { %v3870_v47 = vpop.f32.mrb[54].mxu1 }
 0xb78   :  { %v3795_v53 = vpop.f32.mrb[42].mxu0  ;;  %v5180_v54 = vpop.f32.mrb[55].mxu1 }
 0xb79   :  { %v5173_v36 = vpop.f32.mrb[43].mxu0  ;;  %5209 = vmatprep.mubr.msk.f32.mxu0 %vm494_vm2, %v3795_v53 }
 0xb7a   :  { %5210 = vmatmul.mubr.msk.f32.gmra.mrb[50].mxu0 %vm494_vm2, %v3870_v47 }
 0xb7f   :  { %v4020_v28 = vpop.f32.mrb[56].mxu1 }
 0xb80   :  { %v3945_v48 = vpop.f32.mrb[44].mxu0  ;;  %v5194_v51 = vpop.f32.mrb[57].mxu1 }
 0xb81   :  { %v5187_v63 = vpop.f32.mrb[45].mxu0  ;;  %5212 = vmatprep.mubr.msk.f32.mxu0 %vm494_vm2, %v3945_v48 }
 0xb82   :  { %5213 = vmatmul.mubr.msk.f32.gmra.mrb[52].mxu0 %vm494_vm2, %v4020_v28 }
 0xb83   :  { %5223 = vmatprep.mubr.msk.f32.mxu0 %vm494_vm2, %v6355_v57 }
 0xb86   :  { %5224 = vmatmul.mubr.msk.f32.vlgmr.msra.gmra.mrb[46].mxu0 %vm494_vm2, %v6357_v2 }
 0xb87   :  { %5226 = vmatprep.mubr.msk.f32.mxu0 %vm494_vm2, %v6393_v21 }
 0xb8a   :  { %5227 = vmatmul.mubr.msk.f32.gmra.mrb[48].mxu0 %vm494_vm2, %v6395_v59 }
 0xb8b   :  { %5229 = vmatprep.mubr.msk.f32.mxu0 %vm494_vm2, %v6431_v34 }
 0xb8e   :  { %5230 = vmatmul.mubr.msk.f32.gmra.mrb[50].mxu0 %vm494_vm2, %v6433_v24 }
 0xb8f   :  { %5232 = vmatprep.mubr.msk.f32.mxu0 %vm494_vm2, %v6453_v31 }
 0xb92   :  { %5233 = vmatmul.mubr.msk.f32.gmra.mrb[52].mxu0 %vm494_vm2, %v6455_v20 }
 0xb93   :  { %5694 = shalt.err (!%p5691_p0)
}
 0xb94   :  { %s5695_s25 = scalar_lea.hbm %s6639_s11, 128 }
 0xb95   :  { %p5696_p1 = scmp.ne.s32.totalorder %s6639_s11, %s5695_s25  ;;  %p5699_p2 = scmp.lt.u32.totalorder %s5695_s25, %s6639_s11 }
 0xb97   :  { %p5701_p3 = pnand %p5699_p2, %p5696_p1 }
 0xb99   :  { %5704 = shalt.err (!%p5701_p3)
}
 0xb9a   :  { %4310 = dma.vmem_to_hbm [thread:$0]  %s4308_s23, 128, %s6639_s11, [#allocation11]  }
 0xb9b   :  { %s5769_s7 = smov [#allocation12]  }
 0xb9c   :  { %s4316_s22 = sshll.u32 %s5769_s7, 4  ;;  %s4317_s22 = int_to_ptr.vmem [resolvable:$true] %s4316_s22 }
 0xb9d   :  { %s5705_s8 = scalar_lea.vmem %s4317_s22, 1024  ;;  %p5710_p5 = scmp.lt.s32.totalorder %s4317_s22, %s4317_s22 }
 0xb9e   :  { %p5706_p4 = scmp.ne.s32.totalorder %s4317_s22, %s5705_s8  ;;  %p5711_p6 = scmp.lt.s32.totalorder %s5705_s8, %s5705_s8 }
 0xba0   :  { %p5712_p7 = por %p5711_p6, %p5710_p5 }
 0xba2   :  { %p5713_p8 = pnand %p5712_p7, %p5706_p4 }
 0xba4   :  { %5716 = shalt.err (!%p5713_p8)
}
 0xba5   :  { %s5717_s4 = scalar_lea.hbm %s6640_s12, 1024 }
 0xba6   :  { %p5718_p9 = scmp.ne.s32.totalorder %s6640_s12, %s5717_s4  ;;  %p5721_p10 = scmp.lt.u32.totalorder %s5717_s4, %s6640_s12 }
 0xba8   :  { %p5723_p11 = pnand %p5721_p10, %p5718_p9 }
 0xbaa   :  { %5726 = shalt.err (!%p5723_p11)
}
 0xbab   :  { %4322 = dma.vmem_to_hbm [thread:$0]  %s4317_s22, 1024, %s6640_s12, [#allocation11], %s5758_s13, %s5758_s13, %s5759_s14  }
 0xbac   :  { %v4548_v57 = vld [vmem:[%s6637_s9] ss:$0 sm:$0xff]  ;;  %s5770_s12 = smov [#allocation9]  }
 0xbad   :  { %s4294_s1 = sshll.u32 %s5770_s12, 4  ;;  %s4295_s1 = int_to_ptr.vmem [resolvable:$true] %s4294_s1 }
 0xbae   :  { %s5727_s9 = scalar_lea.vmem %s4295_s1, 1024  ;;  %p5732_p13 = scmp.lt.s32.totalorder %s4295_s1, %s4295_s1 }
 0xbaf   :  { %p5728_p12 = scmp.ne.s32.totalorder %s4295_s1, %s5727_s9  ;;  %p5733_p0 = scmp.lt.s32.totalorder %s5727_s9, %s5727_s9 }
 0xbb1   :  { %p5734_p1 = por %p5733_p0, %p5732_p13 }
 0xbb3   :  { %p5735_p2 = pnand %p5734_p1, %p5728_p12 }
 0xc59   :  { %v5225_v2 = vpop.f32.mrb[46].mxu0 }
 0xc5a   :  { %v4274_v21 = vadd.f32 %v5225_v2, %v4548_v57  ;;  %v4227_v59 = vpop.f32.mrb[47].mxu0 }
 0xc5b   :  { %v4273_v34 = vadd.f32 %v4548_v57, %v4227_v59 }
 0xc5c   :  { %4282 = vst [vmem:[#allocation9 + $0x8] sm:$0xff] %v4274_v21 }
 0xc5d   :  { %4281 = vst [vmem:[#allocation9] sm:$0xff] %v4273_v34  ;;  %v5228_v24 = vpop.f32.mrb[48].mxu0 }
 0xc5e   :  { %v4276_v31 = vadd.f32 %v5228_v24, %v4548_v57  ;;  %v4237_v20 = vpop.f32.mrb[49].mxu0 }
 0xc5f   :  { %v4275_v11 = vadd.f32 %v4548_v57, %v4237_v20 }
 0xc60   :  { %4284 = vst [vmem:[#allocation9 + $0x18] sm:$0xff] %v4276_v31 }
 0xc61   :  { %4283 = vst [vmem:[#allocation9 + $0x10] sm:$0xff] %v4275_v11  ;;  %v5231_v62 = vpop.f32.mrb[50].mxu0 }
 0xc62   :  { %v4278_v49 = vadd.f32 %v5231_v62, %v4548_v57  ;;  %v4247_v60 = vpop.f32.mrb[51].mxu0 }
 0xc63   :  { %v4277_v17 = vadd.f32 %v4548_v57, %v4247_v60 }
 0xc64   :  { %4286 = vst [vmem:[#allocation9 + $0x28] sm:$0xff] %v4278_v49 }
 0xc65   :  { %4285 = vst [vmem:[#allocation9 + $0x20] sm:$0xff] %v4277_v17  ;;  %v5234_v25 = vpop.f32.mrb[52].mxu0 }
 0xc66   :  { %v4280_v26 = vadd.f32 %v5234_v25, %v4548_v57  ;;  %v4257_v14 = vpop.f32.mrb[53].mxu0 }
 0xc67   :  { %v4279_v29 = vadd.f32 %v4548_v57, %v4257_v14 }
 0xc68   :  { %4288 = vst [vmem:[#allocation9 + $0x38] sm:$0xff] %v4280_v26 }
 0xc69   :  { %4287 = vst [vmem:[#allocation9 + $0x30] sm:$0xff] %v4279_v29 }
 0xc6a   :  { %5738 = shalt.err (!%p5735_p2)
}
 0xc6b   :  { %s5739_s2 = scalar_lea.hbm %s6638_s10, 1024 }
 0xc6c   :  { %p5740_p3 = scmp.ne.s32.totalorder %s6638_s10, %s5739_s2  ;;  %p5743_p4 = scmp.lt.u32.totalorder %s5739_s2, %s6638_s10 }
 0xc6e   :  { %p5745_p5 = pnand %p5743_p4, %p5740_p3 }
 0xc70   :  { %5748 = shalt.err (!%p5745_p5)
}
 0xc71   :  { %4300 = dma.vmem_to_hbm [thread:$0]  %s4295_s1, 1024, %s6638_s10, [#allocation5], %s5758_s13, %s5758_s13, %s5759_s14  }
 0xc72   :  { %5753 = dma.done.wait [#allocation5], 1024  }
 0xc73   :  { %5754 = vsyncadd [#allocation5], 4294966272 }
 0xc74   :  { %5755 = dma.done.wait [#allocation11], 1152  }
 0xc75   :  { %5756 = vsyncadd [#allocation11], 4294966144 }
 0xc76   :  { %4332 = vsyncpa [#allocation4], 1 }
 0xc77   :  { %4333 = vsyncpa [#allocation7], 1 }
 0xc78   :  { %4334 = vsyncpa [#allocation5], 1 }
 0xc79   :  { %4335 = vsyncpa [#allocation11], 1 }

</bundles_post_ra>
